<compile_context>
chip_gen: v5e
topology: v5e:2x2
jax: 0.10.0
libtpu: 0.0.40
codegen_flags: <defaults>
</compile_context>

<pallas_src>
import math
import functools

import numpy as np
import jax
import jax.numpy as jnp
from jax import lax
from jax.experimental import pallas as pl
from jax.experimental.pallas import tpu as pltpu


# 9 (3x3 border masks) + 5 ((1,5) pooled masks) + 5 ((5,1) pooled masks)
# + w_even + h_even parity planes.
_NUM_PLANES = 21


# ----------------------------------------------------------------------------
# Fused kernel: one grid step = one batch element, layout (channels, H*W)
# ----------------------------------------------------------------------------
def _ghost_fused_kernel(H, W, Cin, cm, oup,
                        x_ref, planes_ref, pcm_ref, pou_ref, out_ref):
    HW = H * W
    nc2 = oup - cm

    x = x_ref[0]                      # (Cin, HW), lane-dense
    pcm = pcm_ref[...]                # (cm,  Cin + 11) packed weights/biases
    pou = pou_ref[...]                # (oup, Cin + 13) packed weights/biases

    def sh(v, k):
        # sh(v, k)[:, p] == v[:, (p + k) % HW]  -- XLU lane rotate; callers
        # mask wrapped/out-of-range positions with the precomputed planes.
        kk = (-k) % HW
        if kk == 0:
            return v
        return pltpu.roll(v, kk, 1)

    # ---- primary_conv: 1x1 conv (BN scale folded) + bias + ReLU (pure VPU) --
    acc = pcm[:, 0:1] * x[0:1, :]
    for c in range(1, Cin):
        acc = acc + pcm[:, c:c + 1] * x[c:c + 1, :]
    x1 = jnp.maximum(acc + pcm[:, Cin + 9:Cin + 10], 0.0)        # (cm, HW)

    # ---- cheap_operation: depthwise 3x3 (scale folded) + bias + ReLU --------
    acc = pcm[:, Cin + 4:Cin + 5] * x1                            # center tap
    for t in range(9):
        if t == 4:
            continue
        kh, kw_ = divmod(t, 3)
        tap = sh(x1, (kh - 1) * W + (kw_ - 1)) * planes_ref[t:t + 1, :]
        acc = acc + pcm[:, Cin + t:Cin + t + 1] * tap
    x2 = jnp.maximum(acc + pcm[:, Cin + 10:Cin + 11], 0.0)       # (cm, HW)

    # ---- 2x2 avg-pool, kept replicated on the full-res lane grid ------------
    w_even = planes_ref[19:20, :] > 0.5
    h_even = planes_ref[20:21, :] > 0.5
    rsum = x + jnp.where(w_even, sh(x, 1), sh(x, -1))
    xp = 0.25 * (rsum + jnp.where(h_even, sh(rsum, W), sh(rsum, -W)))  # (Cin,HW)

    # ---- short_conv 1x1 (scale folded) + bias --------------------------------
    s0 = pou[:, 0:1] * xp[0:1, :]
    for c in range(1, Cin):
        s0 = s0 + pou[:, c:c + 1] * xp[c:c + 1, :]
    s0 = s0 + pou[:, Cin + 10:Cin + 11]                           # (oup, HW)

    # ---- depthwise (1,5) on the pooled grid (replicated: parity-free taps) --
    s1 = pou[:, Cin + 2:Cin + 3] * s0                             # d = 0
    for t in range(5):
        if t == 2:
            continue
        d = t - 2
        tap = sh(s0, 2 * d) * planes_ref[9 + t:10 + t, :]
        s1 = s1 + pou[:, Cin + t:Cin + t + 1] * tap
    s1 = s1 + pou[:, Cin + 11:Cin + 12]

    # ---- depthwise (5,1) on the pooled grid ----------------------------------
    s2 = pou[:, Cin + 7:Cin + 8] * s1                             # d = 0
    for t in range(5):
        if t == 2:
            continue
        d = t - 2
        tap = sh(s1, 2 * d * W) * planes_ref[14 + t:15 + t, :]
        s2 = s2 + pou[:, Cin + 5 + t:Cin + 6 + t] * tap
    s2 = s2 + pou[:, Cin + 12:Cin + 13]

    # ---- gate = sigmoid(s2): exp and approx reciprocal both on the EUP ------
    gate = pl.reciprocal(1.0 + jnp.exp(-s2), approx=True)        # (oup, HW)

    # torch.cat([x1, x2], 1)[:, :oup] * gate -> written directly, fused.
    # (Two sub-row stores: cm=4 is not 8-sublane aligned, so an in-register
    #  sublane concat would not lower more cheaply than the masked stores.)
    out_ref[0, 0:cm, :] = x1 * gate[0:cm, :]
    if nc2 > 0:
        out_ref[0, cm:oup, :] = x2[0:nc2, :] * gate[cm:oup, :]


# ----------------------------------------------------------------------------
# Parameters (deterministic, synthetic; BN folded to scale/bias)
# ----------------------------------------------------------------------------
def _bn_fold(gamma, beta, mean, var, eps=1e-5):
    scale = gamma / jnp.sqrt(var + eps)
    return scale, beta - mean * scale


def init_params(key, inp, oup, ratio=2, dw_size=3):
    cm = math.ceil(oup / ratio)
    ks = jax.random.split(key, 10)

    def rnd(k, shape, s=0.3):
        return s * jax.random.normal(k, shape, jnp.float32)

    def bn(k, c):
        k1, k2, k3, k4 = jax.random.split(k, 4)
        gamma = 1.0 + 0.1 * jax.random.normal(k1, (c,), jnp.float32)
        beta = 0.1 * jax.random.normal(k2, (c,), jnp.float32)
        mean = 0.1 * jax.random.normal(k3, (c,), jnp.float32)
        var = jnp.abs(jax.random.normal(k4, (c,), jnp.float32)) + 0.5
        s, b = _bn_fold(gamma, beta, mean, var)
        return s.reshape(1, c), b.reshape(1, c)

    p = {}
    p['w_prim'] = rnd(ks[0], (inp, cm))               # 1x1 conv, (Cin, Cm)
    p['w_dw'] = rnd(ks[1], (dw_size * dw_size, cm))   # depthwise 3x3, tap-major
    p['w_s1'] = rnd(ks[2], (inp, oup))                # short 1x1 conv
    p['w_s2'] = rnd(ks[3], (5, oup))                  # depthwise (1,5)
    p['w_s3'] = rnd(ks[4], (5, oup))                  # depthwise (5,1)
    p['bn1_s'], p['bn1_b'] = bn(ks[5], cm)
    p['bn2_s'], p['bn2_b'] = bn(ks[6], cm)
    p['bns1_s'], p['bns1_b'] = bn(ks[7], oup)
    p['bns2_s'], p['bns2_b'] = bn(ks[8], oup)
    p['bns3_s'], p['bns3_b'] = bn(ks[9], oup)
    return p


# ----------------------------------------------------------------------------
# Host-side packing: fold BN scales into weights, pack into 2 arrays + planes
# ----------------------------------------------------------------------------
def _pack_params(params, Cin, cm, oup):
    def fold(w, s):                    # w: (K, Cout), s: (1, Cout) -> (Cout, K)
        return (w * s).T
    wp = fold(params['w_prim'], params['bn1_s'])      # (cm, Cin)
    wd = fold(params['w_dw'], params['bn2_s'])        # (cm, 9)
    w1 = fold(params['w_s1'], params['bns1_s'])       # (oup, Cin)
    w2 = fold(params['w_s2'], params['bns2_s'])       # (oup, 5)
    w3 = fold(params['w_s3'], params['bns3_s'])       # (oup, 5)
    pcm = jnp.concatenate(
        [wp, wd, params['bn1_b'].T, params['bn2_b'].T], axis=1)   # (cm, Cin+11)
    pou = jnp.concatenate(
        [w1, w2, w3, params['bns1_b'].T, params['bns2_b'].T,
         params['bns3_b'].T], axis=1)                              # (oup, Cin+13)
    return pcm.astype(jnp.float32), pou.astype(jnp.float32)


def _make_planes(H, W):
    HW = H * W
    p = np.arange(HW)
    hh, ww = p // W, p % W
    h2, w2 = hh // 2, ww // 2
    planes = np.zeros((_NUM_PLANES, HW), np.float32)
    for t in range(9):                 # 3x3 depthwise border masks (full res)
        kh, kw_ = divmod(t, 3)
        dh, dw = kh - 1, kw_ - 1
        planes[t] = ((hh + dh >= 0) & (hh + dh < H)
                     & (ww + dw >= 0) & (ww + dw < W))
    for t in range(5):                 # pooled-grid masks for (1,5) and (5,1)
        d = t - 2
        planes[9 + t] = (w2 + d >= 0) & (w2 + d < W // 2)
        planes[14 + t] = (h2 + d >= 0) & (h2 + d < H // 2)
    planes[19] = (ww % 2 == 0)         # parity planes (avg-pool selects only)
    planes[20] = (hh % 2 == 0)
    return jnp.asarray(planes)


# ----------------------------------------------------------------------------
# Wrapper (NCHW in / NCHW out) — only free reshapes, no transposes of x/out
# ----------------------------------------------------------------------------
def ghost_module2d_attn(x_nchw, params, oup, ratio=2):
    N, Cin, H, W = x_nchw.shape
    assert H % 2 == 0 and W % 2 == 0
    assert (H * W) % 128 == 0, "lane dim (H*W) must be a multiple of 128"
    cm = math.ceil(oup / ratio)
    HW = H * W

    x = x_nchw.astype(jnp.float32).reshape(N, Cin, HW)   # contiguous view
    planes = _make_planes(H, W)
    pcm, pou = _pack_params(params, Cin, cm, oup)

    def full(shape):
        return pl.BlockSpec(shape, lambda n, _nd=len(shape): (0,) * _nd)

    kern = functools.partial(_ghost_fused_kernel, H, W, Cin, cm, oup)
    out = pl.pallas_call(
        kern,
        out_shape=jax.ShapeDtypeStruct((N, oup, HW), jnp.float32),
        grid=(N,),
        in_specs=[
            pl.BlockSpec((1, Cin, HW), lambda n: (n, 0, 0)),
            full((_NUM_PLANES, HW)),
            full((cm, Cin + 11)),
            full((oup, Cin + 13)),
        ],
        out_specs=pl.BlockSpec((1, oup, HW), lambda n: (n, 0, 0)),
        compiler_params=pltpu.CompilerParams(
            dimension_semantics=("parallel",)),
    )(x, planes, pcm, pou)

    return out.reshape(N, oup, H, W)                      # NCHW, free


# ----------------------------------------------------------------------------
# Pure-JAX reference (mirrors the PyTorch forward, NCHW) for validation
# ----------------------------------------------------------------------------
def _reference(x_nchw, params, oup, ratio=2):
    N, Cin, H, W = x_nchw.shape
    x = x_nchw.astype(jnp.float32)

    def conv1x1(x, w_io):
        return jnp.einsum('nchw,co->nohw', x, w_io)

    def bn(x, s, b):
        return x * s[0][None, :, None, None] + b[0][None, :, None, None]

    def dw(x, w_kc, kh, kw, ph, pw):
        C = x.shape[1]
        k = w_kc.reshape(kh, kw, 1, C)
        return lax.conv_general_dilated(
            x, k, window_strides=(1, 1), padding=((ph, ph), (pw, pw)),
            dimension_numbers=('NCHW', 'HWIO', 'NCHW'),
            feature_group_count=C)

    x1 = jax.nn.relu(bn(conv1x1(x, params['w_prim']),
                        params['bn1_s'], params['bn1_b']))
    x2 = jax.nn.relu(bn(dw(x1, params['w_dw'], 3, 3, 1, 1),
                        params['bn2_s'], params['bn2_b']))
    out = jnp.concatenate([x1, x2], axis=1)[:, :oup]

    xp = x.reshape(N, Cin, H // 2, 2, W // 2, 2).mean(axis=(3, 5))
    r = bn(conv1x1(xp, params['w_s1']), params['bns1_s'], params['bns1_b'])
    r = bn(dw(r, params['w_s2'], 1, 5, 0, 2), params['bns2_s'], params['bns2_b'])
    r = bn(dw(r, params['w_s3'], 5, 1, 2, 0), params['bns3_s'], params['bns3_b'])
    g = jax.nn.sigmoid(r)
    g = jnp.repeat(jnp.repeat(g, 2, axis=2), 2, axis=3)   # nearest 2x upsample
    return out * g


if __name__ == "__main__":
    key = jax.random.PRNGKey(0)
    kx, kp = jax.random.split(key)

    N, Cin, H, W = 2, 4, 16, 16      # small shapes (NCHW, like the PyTorch module)
    oup = 8

    x = jax.random.normal(kx, (N, Cin, H, W), jnp.float32)
    params = init_params(kp, Cin, oup)

    y = ghost_module2d_attn(x, params, oup)
    y = jax.block_until_ready(y)

    y_ref = _reference(x, params, oup)
    np.testing.assert_allclose(np.asarray(y), np.asarray(y_ref),
                               atol=2e-3, rtol=2e-3)
    assert y.shape == (N, oup, H, W)
    print("KERNEL_OK")
</pallas_src>

<mosaic_0001>
module attributes {stable_mosaic.version = 11 : i64} {
  func.func @_ghost_fused_kernel(%arg0: i32, %arg1: memref<1x4x256xf32, #tpu.memory_space<vmem>>, %arg2: memref<21x256xf32, #tpu.memory_space<vmem>>, %arg3: memref<4x15xf32, #tpu.memory_space<vmem>>, %arg4: memref<8x17xf32, #tpu.memory_space<vmem>>, %arg5: memref<1x8x256xf32, #tpu.memory_space<vmem>>) attributes {dimension_semantics = [#tpu.dimension_semantics<parallel>], iteration_bounds = array<i64: 2>, scalar_prefetch = 0 : i64, scratch_operands = 0 : i64, tpu.core_type = #tpu.core_type<tc>, window_params = [{transform_indices = @transform_0, window_bounds = array<i64: 1, 4, 256>}, {pipeline_mode = #tpu.pipeline_mode<synchronous>, transform_indices = @transform_1, window_bounds = array<i64: 21, 256>}, {pipeline_mode = #tpu.pipeline_mode<synchronous>, transform_indices = @transform_2, window_bounds = array<i64: 4, 15>}, {pipeline_mode = #tpu.pipeline_mode<synchronous>, transform_indices = @transform_3, window_bounds = array<i64: 8, 17>}, {transform_indices = @transform_4, window_bounds = array<i64: 1, 8, 256>}]} {
    %c0 = arith.constant 0 : index
    %c0_0 = arith.constant 0 : index
    %c0_1 = arith.constant 0 : index
    %0 = vector.load %arg1[%c0, %c0_0, %c0_1] : memref<1x4x256xf32, #tpu.memory_space<vmem>>, vector<1x4x256xf32>
    %1 = vector.shape_cast %0 : vector<1x4x256xf32> to vector<4x256xf32>
    %c0_2 = arith.constant 0 : index
    %c0_3 = arith.constant 0 : index
    %2 = vector.load %arg3[%c0_2, %c0_3] : memref<4x15xf32, #tpu.memory_space<vmem>>, vector<4x15xf32>
    %c0_4 = arith.constant 0 : index
    %c0_5 = arith.constant 0 : index
    %3 = vector.load %arg4[%c0_4, %c0_5] : memref<8x17xf32, #tpu.memory_space<vmem>>, vector<8x17xf32>
    %4 = vector.extract_strided_slice %2 {offsets = [0, 0], sizes = [4, 1], strides = [1, 1]} : vector<4x15xf32> to vector<4x1xf32>
    %5 = vector.extract_strided_slice %1 {offsets = [0, 0], sizes = [1, 256], strides = [1, 1]} : vector<4x256xf32> to vector<1x256xf32>
    %6 = vector.broadcast %4 : vector<4x1xf32> to vector<4x256xf32>
    %7 = vector.broadcast %5 : vector<1x256xf32> to vector<4x256xf32>
    %8 = arith.mulf %6, %7 : vector<4x256xf32>
    %9 = vector.extract_strided_slice %2 {offsets = [0, 1], sizes = [4, 1], strides = [1, 1]} : vector<4x15xf32> to vector<4x1xf32>
    %10 = vector.extract_strided_slice %1 {offsets = [1, 0], sizes = [1, 256], strides = [1, 1]} : vector<4x256xf32> to vector<1x256xf32>
    %11 = vector.broadcast %9 : vector<4x1xf32> to vector<4x256xf32>
    %12 = vector.broadcast %10 : vector<1x256xf32> to vector<4x256xf32>
    %13 = arith.mulf %11, %12 : vector<4x256xf32>
    %14 = arith.addf %8, %13 : vector<4x256xf32>
    %15 = vector.extract_strided_slice %2 {offsets = [0, 2], sizes = [4, 1], strides = [1, 1]} : vector<4x15xf32> to vector<4x1xf32>
    %16 = vector.extract_strided_slice %1 {offsets = [2, 0], sizes = [1, 256], strides = [1, 1]} : vector<4x256xf32> to vector<1x256xf32>
    %17 = vector.broadcast %15 : vector<4x1xf32> to vector<4x256xf32>
    %18 = vector.broadcast %16 : vector<1x256xf32> to vector<4x256xf32>
    %19 = arith.mulf %17, %18 : vector<4x256xf32>
    %20 = arith.addf %14, %19 : vector<4x256xf32>
    %21 = vector.extract_strided_slice %2 {offsets = [0, 3], sizes = [4, 1], strides = [1, 1]} : vector<4x15xf32> to vector<4x1xf32>
    %22 = vector.extract_strided_slice %1 {offsets = [3, 0], sizes = [1, 256], strides = [1, 1]} : vector<4x256xf32> to vector<1x256xf32>
    %23 = vector.broadcast %21 : vector<4x1xf32> to vector<4x256xf32>
    %24 = vector.broadcast %22 : vector<1x256xf32> to vector<4x256xf32>
    %25 = arith.mulf %23, %24 : vector<4x256xf32>
    %26 = arith.addf %20, %25 : vector<4x256xf32>
    %27 = vector.extract_strided_slice %2 {offsets = [0, 13], sizes = [4, 1], strides = [1, 1]} : vector<4x15xf32> to vector<4x1xf32>
    %28 = vector.broadcast %27 : vector<4x1xf32> to vector<4x256xf32>
    %29 = arith.addf %26, %28 : vector<4x256xf32>
    %cst = arith.constant 0.000000e+00 : f32
    %30 = vector.broadcast %cst : f32 to vector<4x256xf32>
    %31 = arith.maximumf %29, %30 : vector<4x256xf32>
    %32 = vector.extract_strided_slice %2 {offsets = [0, 8], sizes = [4, 1], strides = [1, 1]} : vector<4x15xf32> to vector<4x1xf32>
    %33 = vector.broadcast %32 : vector<4x1xf32> to vector<4x256xf32>
    %34 = arith.mulf %33, %31 : vector<4x256xf32>
    %c17_i32 = arith.constant 17 : i32
    %35 = tpu.dynamic_rotate %31 by %c17_i32 dim 1 : vector<4x256xf32>, i32 -> vector<4x256xf32>
    %c0_6 = arith.constant 0 : index
    %c0_7 = arith.constant 0 : index
    %36 = vector.load %arg2[%c0_6, %c0_7] : memref<21x256xf32, #tpu.memory_space<vmem>>, vector<1x256xf32>
    %37 = vector.broadcast %36 : vector<1x256xf32> to vector<4x256xf32>
    %38 = arith.mulf %35, %37 : vector<4x256xf32>
    %39 = vector.extract_strided_slice %2 {offsets = [0, 4], sizes = [4, 1], strides = [1, 1]} : vector<4x15xf32> to vector<4x1xf32>
    %40 = vector.broadcast %39 : vector<4x1xf32> to vector<4x256xf32>
    %41 = arith.mulf %40, %38 : vector<4x256xf32>
    %42 = arith.addf %34, %41 : vector<4x256xf32>
    %c16_i32 = arith.constant 16 : i32
    %43 = tpu.dynamic_rotate %31 by %c16_i32 dim 1 : vector<4x256xf32>, i32 -> vector<4x256xf32>
    %c1 = arith.constant 1 : index
    %c0_8 = arith.constant 0 : index
    %44 = vector.load %arg2[%c1, %c0_8] : memref<21x256xf32, #tpu.memory_space<vmem>>, vector<1x256xf32>
    %45 = vector.broadcast %44 : vector<1x256xf32> to vector<4x256xf32>
    %46 = arith.mulf %43, %45 : vector<4x256xf32>
    %47 = vector.extract_strided_slice %2 {offsets = [0, 5], sizes = [4, 1], strides = [1, 1]} : vector<4x15xf32> to vector<4x1xf32>
    %48 = vector.broadcast %47 : vector<4x1xf32> to vector<4x256xf32>
    %49 = arith.mulf %48, %46 : vector<4x256xf32>
    %50 = arith.addf %42, %49 : vector<4x256xf32>
    %c15_i32 = arith.constant 15 : i32
    %51 = tpu.dynamic_rotate %31 by %c15_i32 dim 1 : vector<4x256xf32>, i32 -> vector<4x256xf32>
    %c2 = arith.constant 2 : index
    %c0_9 = arith.constant 0 : index
    %52 = vector.load %arg2[%c2, %c0_9] : memref<21x256xf32, #tpu.memory_space<vmem>>, vector<1x256xf32>
    %53 = vector.broadcast %52 : vector<1x256xf32> to vector<4x256xf32>
    %54 = arith.mulf %51, %53 : vector<4x256xf32>
    %55 = vector.extract_strided_slice %2 {offsets = [0, 6], sizes = [4, 1], strides = [1, 1]} : vector<4x15xf32> to vector<4x1xf32>
    %56 = vector.broadcast %55 : vector<4x1xf32> to vector<4x256xf32>
    %57 = arith.mulf %56, %54 : vector<4x256xf32>
    %58 = arith.addf %50, %57 : vector<4x256xf32>
    %c1_i32 = arith.constant 1 : i32
    %59 = tpu.dynamic_rotate %31 by %c1_i32 dim 1 : vector<4x256xf32>, i32 -> vector<4x256xf32>
    %c3 = arith.constant 3 : index
    %c0_10 = arith.constant 0 : index
    %60 = vector.load %arg2[%c3, %c0_10] : memref<21x256xf32, #tpu.memory_space<vmem>>, vector<1x256xf32>
    %61 = vector.broadcast %60 : vector<1x256xf32> to vector<4x256xf32>
    %62 = arith.mulf %59, %61 : vector<4x256xf32>
    %63 = vector.extract_strided_slice %2 {offsets = [0, 7], sizes = [4, 1], strides = [1, 1]} : vector<4x15xf32> to vector<4x1xf32>
    %64 = vector.broadcast %63 : vector<4x1xf32> to vector<4x256xf32>
    %65 = arith.mulf %64, %62 : vector<4x256xf32>
    %66 = arith.addf %58, %65 : vector<4x256xf32>
    %c255_i32 = arith.constant 255 : i32
    %67 = tpu.dynamic_rotate %31 by %c255_i32 dim 1 : vector<4x256xf32>, i32 -> vector<4x256xf32>
    %c5 = arith.constant 5 : index
    %c0_11 = arith.constant 0 : index
    %68 = vector.load %arg2[%c5, %c0_11] : memref<21x256xf32, #tpu.memory_space<vmem>>, vector<1x256xf32>
    %69 = vector.broadcast %68 : vector<1x256xf32> to vector<4x256xf32>
    %70 = arith.mulf %67, %69 : vector<4x256xf32>
    %71 = vector.extract_strided_slice %2 {offsets = [0, 9], sizes = [4, 1], strides = [1, 1]} : vector<4x15xf32> to vector<4x1xf32>
    %72 = vector.broadcast %71 : vector<4x1xf32> to vector<4x256xf32>
    %73 = arith.mulf %72, %70 : vector<4x256xf32>
    %74 = arith.addf %66, %73 : vector<4x256xf32>
    %c241_i32 = arith.constant 241 : i32
    %75 = tpu.dynamic_rotate %31 by %c241_i32 dim 1 : vector<4x256xf32>, i32 -> vector<4x256xf32>
    %c6 = arith.constant 6 : index
    %c0_12 = arith.constant 0 : index
    %76 = vector.load %arg2[%c6, %c0_12] : memref<21x256xf32, #tpu.memory_space<vmem>>, vector<1x256xf32>
    %77 = vector.broadcast %76 : vector<1x256xf32> to vector<4x256xf32>
    %78 = arith.mulf %75, %77 : vector<4x256xf32>
    %79 = vector.extract_strided_slice %2 {offsets = [0, 10], sizes = [4, 1], strides = [1, 1]} : vector<4x15xf32> to vector<4x1xf32>
    %80 = vector.broadcast %79 : vector<4x1xf32> to vector<4x256xf32>
    %81 = arith.mulf %80, %78 : vector<4x256xf32>
    %82 = arith.addf %74, %81 : vector<4x256xf32>
    %c240_i32 = arith.constant 240 : i32
    %83 = tpu.dynamic_rotate %31 by %c240_i32 dim 1 : vector<4x256xf32>, i32 -> vector<4x256xf32>
    %c7 = arith.constant 7 : index
    %c0_13 = arith.constant 0 : index
    %84 = vector.load %arg2[%c7, %c0_13] : memref<21x256xf32, #tpu.memory_space<vmem>>, vector<1x256xf32>
    %85 = vector.broadcast %84 : vector<1x256xf32> to vector<4x256xf32>
    %86 = arith.mulf %83, %85 : vector<4x256xf32>
    %87 = vector.extract_strided_slice %2 {offsets = [0, 11], sizes = [4, 1], strides = [1, 1]} : vector<4x15xf32> to vector<4x1xf32>
    %88 = vector.broadcast %87 : vector<4x1xf32> to vector<4x256xf32>
    %89 = arith.mulf %88, %86 : vector<4x256xf32>
    %90 = arith.addf %82, %89 : vector<4x256xf32>
    %c239_i32 = arith.constant 239 : i32
    %91 = tpu.dynamic_rotate %31 by %c239_i32 dim 1 : vector<4x256xf32>, i32 -> vector<4x256xf32>
    %c8 = arith.constant 8 : index
    %c0_14 = arith.constant 0 : index
    %92 = vector.load %arg2[%c8, %c0_14] : memref<21x256xf32, #tpu.memory_space<vmem>>, vector<1x256xf32>
    %93 = vector.broadcast %92 : vector<1x256xf32> to vector<4x256xf32>
    %94 = arith.mulf %91, %93 : vector<4x256xf32>
    %95 = vector.extract_strided_slice %2 {offsets = [0, 12], sizes = [4, 1], strides = [1, 1]} : vector<4x15xf32> to vector<4x1xf32>
    %96 = vector.broadcast %95 : vector<4x1xf32> to vector<4x256xf32>
    %97 = arith.mulf %96, %94 : vector<4x256xf32>
    %98 = arith.addf %90, %97 : vector<4x256xf32>
    %99 = vector.extract_strided_slice %2 {offsets = [0, 14], sizes = [4, 1], strides = [1, 1]} : vector<4x15xf32> to vector<4x1xf32>
    %100 = vector.broadcast %99 : vector<4x1xf32> to vector<4x256xf32>
    %101 = arith.addf %98, %100 : vector<4x256xf32>
    %cst_15 = arith.constant 0.000000e+00 : f32
    %102 = vector.broadcast %cst_15 : f32 to vector<4x256xf32>
    %103 = arith.maximumf %101, %102 : vector<4x256xf32>
    %c19 = arith.constant 19 : index
    %c0_16 = arith.constant 0 : index
    %104 = vector.load %arg2[%c19, %c0_16] : memref<21x256xf32, #tpu.memory_space<vmem>>, vector<1x256xf32>
    %cst_17 = arith.constant 5.000000e-01 : f32
    %105 = vector.broadcast %cst_17 : f32 to vector<1x256xf32>
    %106 = arith.cmpf ogt, %104, %105 : vector<1x256xf32>
    %c20 = arith.constant 20 : index
    %c0_18 = arith.constant 0 : index
    %107 = vector.load %arg2[%c20, %c0_18] : memref<21x256xf32, #tpu.memory_space<vmem>>, vector<1x256xf32>
    %cst_19 = arith.constant 5.000000e-01 : f32
    %108 = vector.broadcast %cst_19 : f32 to vector<1x256xf32>
    %109 = arith.cmpf ogt, %107, %108 : vector<1x256xf32>
    %c255_i32_20 = arith.constant 255 : i32
    %110 = tpu.dynamic_rotate %1 by %c255_i32_20 dim 1 : vector<4x256xf32>, i32 -> vector<4x256xf32>
    %c1_i32_21 = arith.constant 1 : i32
    %111 = tpu.dynamic_rotate %1 by %c1_i32_21 dim 1 : vector<4x256xf32>, i32 -> vector<4x256xf32>
    %112 = vector.shape_cast %106 : vector<1x256xi1> to vector<1x256xi1>
    %113 = vector.broadcast %112 : vector<1x256xi1> to vector<4x256xi1>
    %114 = arith.select %113, %110, %111 : vector<4x256xi1>, vector<4x256xf32>
    %115 = arith.addf %1, %114 : vector<4x256xf32>
    %c240_i32_22 = arith.constant 240 : i32
    %116 = tpu.dynamic_rotate %115 by %c240_i32_22 dim 1 : vector<4x256xf32>, i32 -> vector<4x256xf32>
    %c16_i32_23 = arith.constant 16 : i32
    %117 = tpu.dynamic_rotate %115 by %c16_i32_23 dim 1 : vector<4x256xf32>, i32 -> vector<4x256xf32>
    %118 = vector.shape_cast %109 : vector<1x256xi1> to vector<1x256xi1>
    %119 = vector.broadcast %118 : vector<1x256xi1> to vector<4x256xi1>
    %120 = arith.select %119, %116, %117 : vector<4x256xi1>, vector<4x256xf32>
    %121 = arith.addf %115, %120 : vector<4x256xf32>
    %cst_24 = arith.constant 2.500000e-01 : f32
    %122 = vector.broadcast %cst_24 : f32 to vector<4x256xf32>
    %123 = arith.mulf %122, %121 : vector<4x256xf32>
    %124 = vector.extract_strided_slice %3 {offsets = [0, 0], sizes = [8, 1], strides = [1, 1]} : vector<8x17xf32> to vector<8x1xf32>
    %125 = vector.extract_strided_slice %123 {offsets = [0, 0], sizes = [1, 256], strides = [1, 1]} : vector<4x256xf32> to vector<1x256xf32>
    %126 = vector.broadcast %124 : vector<8x1xf32> to vector<8x256xf32>
    %127 = vector.broadcast %125 : vector<1x256xf32> to vector<8x256xf32>
    %128 = arith.mulf %126, %127 : vector<8x256xf32>
    %129 = vector.extract_strided_slice %3 {offsets = [0, 1], sizes = [8, 1], strides = [1, 1]} : vector<8x17xf32> to vector<8x1xf32>
    %130 = vector.extract_strided_slice %123 {offsets = [1, 0], sizes = [1, 256], strides = [1, 1]} : vector<4x256xf32> to vector<1x256xf32>
    %131 = vector.broadcast %129 : vector<8x1xf32> to vector<8x256xf32>
    %132 = vector.broadcast %130 : vector<1x256xf32> to vector<8x256xf32>
    %133 = arith.mulf %131, %132 : vector<8x256xf32>
    %134 = arith.addf %128, %133 : vector<8x256xf32>
    %135 = vector.extract_strided_slice %3 {offsets = [0, 2], sizes = [8, 1], strides = [1, 1]} : vector<8x17xf32> to vector<8x1xf32>
    %136 = vector.extract_strided_slice %123 {offsets = [2, 0], sizes = [1, 256], strides = [1, 1]} : vector<4x256xf32> to vector<1x256xf32>
    %137 = vector.broadcast %135 : vector<8x1xf32> to vector<8x256xf32>
    %138 = vector.broadcast %136 : vector<1x256xf32> to vector<8x256xf32>
    %139 = arith.mulf %137, %138 : vector<8x256xf32>
    %140 = arith.addf %134, %139 : vector<8x256xf32>
    %141 = vector.extract_strided_slice %3 {offsets = [0, 3], sizes = [8, 1], strides = [1, 1]} : vector<8x17xf32> to vector<8x1xf32>
    %142 = vector.extract_strided_slice %123 {offsets = [3, 0], sizes = [1, 256], strides = [1, 1]} : vector<4x256xf32> to vector<1x256xf32>
    %143 = vector.broadcast %141 : vector<8x1xf32> to vector<8x256xf32>
    %144 = vector.broadcast %142 : vector<1x256xf32> to vector<8x256xf32>
    %145 = arith.mulf %143, %144 : vector<8x256xf32>
    %146 = arith.addf %140, %145 : vector<8x256xf32>
    %147 = vector.extract_strided_slice %3 {offsets = [0, 14], sizes = [8, 1], strides = [1, 1]} : vector<8x17xf32> to vector<8x1xf32>
    %148 = vector.broadcast %147 : vector<8x1xf32> to vector<8x256xf32>
    %149 = arith.addf %146, %148 : vector<8x256xf32>
    %150 = vector.extract_strided_slice %3 {offsets = [0, 6], sizes = [8, 1], strides = [1, 1]} : vector<8x17xf32> to vector<8x1xf32>
    %151 = vector.broadcast %150 : vector<8x1xf32> to vector<8x256xf32>
    %152 = arith.mulf %151, %149 : vector<8x256xf32>
    %c4_i32 = arith.constant 4 : i32
    %153 = tpu.dynamic_rotate %149 by %c4_i32 dim 1 : vector<8x256xf32>, i32 -> vector<8x256xf32>
    %c9 = arith.constant 9 : index
    %c0_25 = arith.constant 0 : index
    %154 = vector.load %arg2[%c9, %c0_25] : memref<21x256xf32, #tpu.memory_space<vmem>>, vector<1x256xf32>
    %155 = vector.broadcast %154 : vector<1x256xf32> to vector<8x256xf32>
    %156 = arith.mulf %153, %155 : vector<8x256xf32>
    %157 = vector.extract_strided_slice %3 {offsets = [0, 4], sizes = [8, 1], strides = [1, 1]} : vector<8x17xf32> to vector<8x1xf32>
    %158 = vector.broadcast %157 : vector<8x1xf32> to vector<8x256xf32>
    %159 = arith.mulf %158, %156 : vector<8x256xf32>
    %160 = arith.addf %152, %159 : vector<8x256xf32>
    %c2_i32 = arith.constant 2 : i32
    %161 = tpu.dynamic_rotate %149 by %c2_i32 dim 1 : vector<8x256xf32>, i32 -> vector<8x256xf32>
    %c10 = arith.constant 10 : index
    %c0_26 = arith.constant 0 : index
    %162 = vector.load %arg2[%c10, %c0_26] : memref<21x256xf32, #tpu.memory_space<vmem>>, vector<1x256xf32>
    %163 = vector.broadcast %162 : vector<1x256xf32> to vector<8x256xf32>
    %164 = arith.mulf %161, %163 : vector<8x256xf32>
    %165 = vector.extract_strided_slice %3 {offsets = [0, 5], sizes = [8, 1], strides = [1, 1]} : vector<8x17xf32> to vector<8x1xf32>
    %166 = vector.broadcast %165 : vector<8x1xf32> to vector<8x256xf32>
    %167 = arith.mulf %166, %164 : vector<8x256xf32>
    %168 = arith.addf %160, %167 : vector<8x256xf32>
    %c254_i32 = arith.constant 254 : i32
    %169 = tpu.dynamic_rotate %149 by %c254_i32 dim 1 : vector<8x256xf32>, i32 -> vector<8x256xf32>
    %c12 = arith.constant 12 : index
    %c0_27 = arith.constant 0 : index
    %170 = vector.load %arg2[%c12, %c0_27] : memref<21x256xf32, #tpu.memory_space<vmem>>, vector<1x256xf32>
    %171 = vector.broadcast %170 : vector<1x256xf32> to vector<8x256xf32>
    %172 = arith.mulf %169, %171 : vector<8x256xf32>
    %173 = vector.extract_strided_slice %3 {offsets = [0, 7], sizes = [8, 1], strides = [1, 1]} : vector<8x17xf32> to vector<8x1xf32>
    %174 = vector.broadcast %173 : vector<8x1xf32> to vector<8x256xf32>
    %175 = arith.mulf %174, %172 : vector<8x256xf32>
    %176 = arith.addf %168, %175 : vector<8x256xf32>
    %c252_i32 = arith.constant 252 : i32
    %177 = tpu.dynamic_rotate %149 by %c252_i32 dim 1 : vector<8x256xf32>, i32 -> vector<8x256xf32>
    %c13 = arith.constant 13 : index
    %c0_28 = arith.constant 0 : index
    %178 = vector.load %arg2[%c13, %c0_28] : memref<21x256xf32, #tpu.memory_space<vmem>>, vector<1x256xf32>
    %179 = vector.broadcast %178 : vector<1x256xf32> to vector<8x256xf32>
    %180 = arith.mulf %177, %179 : vector<8x256xf32>
    %181 = vector.extract_strided_slice %3 {offsets = [0, 8], sizes = [8, 1], strides = [1, 1]} : vector<8x17xf32> to vector<8x1xf32>
    %182 = vector.broadcast %181 : vector<8x1xf32> to vector<8x256xf32>
    %183 = arith.mulf %182, %180 : vector<8x256xf32>
    %184 = arith.addf %176, %183 : vector<8x256xf32>
    %185 = vector.extract_strided_slice %3 {offsets = [0, 15], sizes = [8, 1], strides = [1, 1]} : vector<8x17xf32> to vector<8x1xf32>
    %186 = vector.broadcast %185 : vector<8x1xf32> to vector<8x256xf32>
    %187 = arith.addf %184, %186 : vector<8x256xf32>
    %188 = vector.extract_strided_slice %3 {offsets = [0, 11], sizes = [8, 1], strides = [1, 1]} : vector<8x17xf32> to vector<8x1xf32>
    %189 = vector.broadcast %188 : vector<8x1xf32> to vector<8x256xf32>
    %190 = arith.mulf %189, %187 : vector<8x256xf32>
    %c64_i32 = arith.constant 64 : i32
    %191 = tpu.dynamic_rotate %187 by %c64_i32 dim 1 : vector<8x256xf32>, i32 -> vector<8x256xf32>
    %c14 = arith.constant 14 : index
    %c0_29 = arith.constant 0 : index
    %192 = vector.load %arg2[%c14, %c0_29] : memref<21x256xf32, #tpu.memory_space<vmem>>, vector<1x256xf32>
    %193 = vector.broadcast %192 : vector<1x256xf32> to vector<8x256xf32>
    %194 = arith.mulf %191, %193 : vector<8x256xf32>
    %195 = vector.extract_strided_slice %3 {offsets = [0, 9], sizes = [8, 1], strides = [1, 1]} : vector<8x17xf32> to vector<8x1xf32>
    %196 = vector.broadcast %195 : vector<8x1xf32> to vector<8x256xf32>
    %197 = arith.mulf %196, %194 : vector<8x256xf32>
    %198 = arith.addf %190, %197 : vector<8x256xf32>
    %c32_i32 = arith.constant 32 : i32
    %199 = tpu.dynamic_rotate %187 by %c32_i32 dim 1 : vector<8x256xf32>, i32 -> vector<8x256xf32>
    %c15 = arith.constant 15 : index
    %c0_30 = arith.constant 0 : index
    %200 = vector.load %arg2[%c15, %c0_30] : memref<21x256xf32, #tpu.memory_space<vmem>>, vector<1x256xf32>
    %201 = vector.broadcast %200 : vector<1x256xf32> to vector<8x256xf32>
    %202 = arith.mulf %199, %201 : vector<8x256xf32>
    %203 = vector.extract_strided_slice %3 {offsets = [0, 10], sizes = [8, 1], strides = [1, 1]} : vector<8x17xf32> to vector<8x1xf32>
    %204 = vector.broadcast %203 : vector<8x1xf32> to vector<8x256xf32>
    %205 = arith.mulf %204, %202 : vector<8x256xf32>
    %206 = arith.addf %198, %205 : vector<8x256xf32>
    %c224_i32 = arith.constant 224 : i32
    %207 = tpu.dynamic_rotate %187 by %c224_i32 dim 1 : vector<8x256xf32>, i32 -> vector<8x256xf32>
    %c17 = arith.constant 17 : index
    %c0_31 = arith.constant 0 : index
    %208 = vector.load %arg2[%c17, %c0_31] : memref<21x256xf32, #tpu.memory_space<vmem>>, vector<1x256xf32>
    %209 = vector.broadcast %208 : vector<1x256xf32> to vector<8x256xf32>
    %210 = arith.mulf %207, %209 : vector<8x256xf32>
    %211 = vector.extract_strided_slice %3 {offsets = [0, 12], sizes = [8, 1], strides = [1, 1]} : vector<8x17xf32> to vector<8x1xf32>
    %212 = vector.broadcast %211 : vector<8x1xf32> to vector<8x256xf32>
    %213 = arith.mulf %212, %210 : vector<8x256xf32>
    %214 = arith.addf %206, %213 : vector<8x256xf32>
    %c192_i32 = arith.constant 192 : i32
    %215 = tpu.dynamic_rotate %187 by %c192_i32 dim 1 : vector<8x256xf32>, i32 -> vector<8x256xf32>
    %c18 = arith.constant 18 : index
    %c0_32 = arith.constant 0 : index
    %216 = vector.load %arg2[%c18, %c0_32] : memref<21x256xf32, #tpu.memory_space<vmem>>, vector<1x256xf32>
    %217 = vector.broadcast %216 : vector<1x256xf32> to vector<8x256xf32>
    %218 = arith.mulf %215, %217 : vector<8x256xf32>
    %219 = vector.extract_strided_slice %3 {offsets = [0, 13], sizes = [8, 1], strides = [1, 1]} : vector<8x17xf32> to vector<8x1xf32>
    %220 = vector.broadcast %219 : vector<8x1xf32> to vector<8x256xf32>
    %221 = arith.mulf %220, %218 : vector<8x256xf32>
    %222 = arith.addf %214, %221 : vector<8x256xf32>
    %223 = vector.extract_strided_slice %3 {offsets = [0, 16], sizes = [8, 1], strides = [1, 1]} : vector<8x17xf32> to vector<8x1xf32>
    %224 = vector.broadcast %223 : vector<8x1xf32> to vector<8x256xf32>
    %225 = arith.addf %222, %224 : vector<8x256xf32>
    %cst_33 = arith.constant 0.000000e+00 : f32
    %226 = vector.broadcast %cst_33 : f32 to vector<8x256xf32>
    %227 = arith.subf %226, %225 : vector<8x256xf32>
    %228 = math.exp %227 : vector<8x256xf32>
    %cst_34 = arith.constant 1.000000e+00 : f32
    %229 = vector.broadcast %cst_34 : f32 to vector<8x256xf32>
    %230 = arith.addf %229, %228 : vector<8x256xf32>
    %231 = tpu.reciprocal %230 {approx = true} : vector<8x256xf32> -> vector<8x256xf32>
    %232 = vector.extract_strided_slice %231 {offsets = [0, 0], sizes = [4, 256], strides = [1, 1]} : vector<8x256xf32> to vector<4x256xf32>
    %233 = arith.mulf %31, %232 : vector<4x256xf32>
    %c0_35 = arith.constant 0 : index
    %c0_36 = arith.constant 0 : index
    %c0_37 = arith.constant 0 : index
    %234 = vector.load %arg5[%c0_35, %c0_36, %c0_37] : memref<1x8x256xf32, #tpu.memory_space<vmem>>, vector<1x4x256xf32>
    %235 = vector.shape_cast %234 : vector<1x4x256xf32> to vector<4x256xf32>
    %236 = vector.shape_cast %233 : vector<4x256xf32> to vector<1x4x256xf32>
    tpu.vector_store %arg5[%c0_35, %c0_36, %c0_37], %236 {strides = array<i32>} : memref<1x8x256xf32, #tpu.memory_space<vmem>>, vector<1x4x256xf32>,
    %237 = vector.extract_strided_slice %231 {offsets = [4, 0], sizes = [4, 256], strides = [1, 1]} : vector<8x256xf32> to vector<4x256xf32>
    %238 = arith.mulf %103, %237 : vector<4x256xf32>
    %c0_38 = arith.constant 0 : index
    %c4 = arith.constant 4 : index
    %c0_39 = arith.constant 0 : index
    %239 = vector.load %arg5[%c0_38, %c4, %c0_39] : memref<1x8x256xf32, #tpu.memory_space<vmem>>, vector<1x4x256xf32>
    %240 = vector.shape_cast %239 : vector<1x4x256xf32> to vector<4x256xf32>
    %241 = vector.shape_cast %238 : vector<4x256xf32> to vector<1x4x256xf32>
    tpu.vector_store %arg5[%c0_38, %c4, %c0_39], %241 {strides = array<i32>} : memref<1x8x256xf32, #tpu.memory_space<vmem>>, vector<1x4x256xf32>,
    return
  }
  func.func @transform_0(%arg0: i32) -> (i32, i32, i32) {
    %c0_i32 = arith.constant 0 : i32
    %c0_i32_0 = arith.constant 0 : i32
    %c0_i32_1 = arith.constant 0 : i32
    return %arg0, %c0_i32, %c0_i32_0 : i32, i32, i32
  }
  func.func @transform_1(%arg0: i32) -> (i32, i32) {
    %c0_i32 = arith.constant 0 : i32
    %c0_i32_0 = arith.constant 0 : i32
    %c0_i32_1 = arith.constant 0 : i32
    return %c0_i32, %c0_i32_0 : i32, i32
  }
  func.func @transform_2(%arg0: i32) -> (i32, i32) {
    %c0_i32 = arith.constant 0 : i32
    %c0_i32_0 = arith.constant 0 : i32
    %c0_i32_1 = arith.constant 0 : i32
    return %c0_i32, %c0_i32_0 : i32, i32
  }
  func.func @transform_3(%arg0: i32) -> (i32, i32) {
    %c0_i32 = arith.constant 0 : i32
    %c0_i32_0 = arith.constant 0 : i32
    %c0_i32_1 = arith.constant 0 : i32
    return %c0_i32, %c0_i32_0 : i32, i32
  }
  func.func @transform_4(%arg0: i32) -> (i32, i32, i32) {
    %c0_i32 = arith.constant 0 : i32
    %c0_i32_0 = arith.constant 0 : i32
    %c0_i32_1 = arith.constant 0 : i32
    return %arg0, %c0_i32, %c0_i32_0 : i32, i32, i32
  }
}

</mosaic_0001>

<bundles_post_ra>
// kernel: tpu_custom_call.1
= control target key start
LH: loop header
LB: loop body
LE: loop exit
PB: predicated region body
PF: predicated region fallthrough
CT: control target
= control target key end

     0   :  { %9 = vsyncpa [#allocation3], 0  ;;  %s1844_s0 = inlined_call_operand.hbm [shape: f32[2,4,256], index: 0, kind: input, shape index: {}]   ;;  %s1845_s1 = inlined_call_operand.hbm [shape: f32[21,256], index: 1, kind: input, shape index: {}]   ;;  %s1846_s2 = inlined_call_operand.hbm [shape: f32[4,15], index: 2, kind: input, shape index: {}]   ;;  %s1847_s3 = inlined_call_operand.hbm [shape: f32[8,17], index: 3, kind: input, shape index: {}]   ;;  %s1848_s4 = inlined_call_operand.hbm [shape: f32[2,8,256], index: 4, kind: output, shape index: {}]  }
   0x1   :  { %11 = vsyncpa [#allocation3 + $0x1], 0 }
   0x2   :  { %12 = vsyncpa [#allocation6], 0 }
   0x3   :  { %13 = vsyncpa [#allocation9], 0 }
   0x4   :  { %14 = vsyncpa [#allocation4], 0 }
   0x5   :  { %16 = vsyncpa [#allocation4 + $0x1], 0  ;;  %s1462_s15 = smov 0   ;;  %s1464_s16 = smov 0  }
   0x6   :  { %s1466_s17 = smov 0   ;;  %s1468_s18 = smov 0  }
   0x7 LB: > { %s153_s21 = sshll.u32 %s1845_s1, 4  ;;  %s1486_s22 = sadd.s32 4294967295, %s1398_s18   ;;  %s1398_s18 = sphi %s1468_s18, %s1861_s18   ;;  %s1394_s17 = sphi %s1466_s17, %s1860_s17   ;;  %s1390_s16 = sphi %s1464_s16, %s1859_s16   ;;  %s1386_s15 = sphi %s1462_s15, %s1858_s15   ;;  %s154_s21 = int_to_ptr.hbm [resolvable:$true] %s153_s21 }
   0x8   : > { %p1033_p0 = scmp.ge.s32.totalorder %s1398_s18, 1  ;;  %p43_p1 = scmp.eq.s32.totalorder %s1486_s22, 0 }
   0x9   : > { %p142_p2 = scmp.lt.s32.totalorder %s1398_s18, 3  ;;  %s1400_s24 = smov [#allocation5]  }
   0xa   : > { %s155_s25 = sshll.u32 %s1400_s24, 4  ;;  %s168_s28 = sshll.u32 %s1846_s2, 4  ;;  %s156_s25 = int_to_ptr.vmem [resolvable:$true] %s155_s25  ;;  %s169_s28 = int_to_ptr.hbm [resolvable:$true] %s168_s28 }
   0xb   : > { %p1491_p3 = pnand %p1033_p0, %p142_p2  ;;  %s180_s6 = sshll.u32 %s1847_s3, 4  ;;  %s181_s6 = int_to_ptr.hbm [resolvable:$true] %s180_s6 }
   0xc   : > { %s1401_s7 = smov [#allocation7]   ;;  %s1402_s9 = smov 256  }
   0xd   : > { %p1070_p4 = pneg %p1491_p3  ;;  %s170_s8 = sshll.u32 %s1401_s7, 4  ;;  %s171_s8 = int_to_ptr.vmem [resolvable:$true] %s170_s8 }
   0xe   : > { %s1403_s10 = smov 16   ;;  %s1404_s11 = smov [#allocation8]  }
   0xf   : > { %p1503_p6 = pnand %p1070_p4, %p43_p1  ;;  %s182_s12 = sshll.u32 %s1404_s11, 4  ;;  %s183_s12 = int_to_ptr.vmem [resolvable:$true] %s182_s12 }
  0x10   : > { %s1032_s13 = sadd.s32 4294967294, %s1398_s18   ;;  %s1518_s14 = sadd.s32 1, %s1398_s18  }
  0x11   : > { %1073 = dma.hbm_to_vmem [thread:$0]  (!%p1503_p6), %s154_s21, 768, %s156_s25, [#allocation6], %s1402_s9, %s1402_s9, %s1403_s10  }
  0x12   : > { %1076 = dma.hbm_to_vmem [thread:$0]  (!%p1503_p6), %s169_s28, 64, %s171_s8, [#allocation6]  }
  0x13   : > { %1079 = dma.hbm_to_vmem [thread:$0]  (!%p1503_p6), %s181_s6, 128, %s183_s12, [#allocation9]  }
  0x14   : > { %s29_s19 = sadd.s32 1, %s1394_s17  ;;  %s26_s20 = ssub.s32 %s1398_s18, %s1518_s14 }
  0x15   : > { %p36_p7 = scmp.ne.s32.totalorder %s1394_s17, %s1390_s16  ;;  %p27_p8 = scmp.eq.s32.totalorder %s26_s20, 0 }
  0x16   : > { %p37_p9 = scmp.eq.s32.totalorder %s1398_s18, 0  ;;  %p42_p10 = scmp.ne.s32.totalorder %s1390_s16, %s1386_s15 }
  0x17   : > { %p129_p11 = scmp.eq.s32.totalorder %s1486_s22, 1  ;;  %p135_p0 = scmp.eq.s32.totalorder %s1032_s13, 1 }
  0x18   : > { %s1530_s21 = scalar_select %p27_p8, %s1394_s17, %s29_s19  }
  0x19   : > { %p1534_p12 = por %p43_p1, %p42_p10  ;;  %p1538_p13 = por %p129_p11, %p36_p7 }
  0x1a   : > { %p38_p2 = por %p37_p9, %p36_p7  ;;  %s193_s26 = sand.u32 1, %s1394_s17  }
  0x1b   : > { %p1543_p4 = por %p135_p0, %p42_p10  ;;  %p1091_p6 = scmp.lt.s32.totalorder %s1398_s18, 2 }
  0x1c   : > { %s1038_s28 = sshll.u32 %s193_s26, 3  ;;  %s1052_s29 = sshll.u32 %s1398_s18, 3 }
  0x1d   : > { %s202_s6 = scalar_lea.hbm %s1844_s0, %s1052_s29  ;;  %s197_s8 = scalar_lea.vmem [#allocation2], %s1038_s28 }
  0x1e   : > { %s204_s7 = sshll.u32 %s202_s6, 4  ;;  %s206_s9 = sshll.u32 %s197_s8, 4  ;;  %s205_s7 = int_to_ptr.hbm [resolvable:$true] %s204_s7  ;;  %s207_s9 = int_to_ptr.vmem [resolvable:$true] %s206_s9 }
  0x1f   : > { %p1552_p8 = pnand %p1091_p6, %p38_p2  ;;  %s194_s11 = scalar_lea.sflag [#allocation3], %s193_s26 }
  0x20   : > { %s1294_s12 = sshra.s32 %s205_s7, 4  ;;  %s1301_s28 = scalar_lea.hbm %s1844_s0, 16  ;;  %s1295_s12 = int_to_ptr.hbm [resolvable:$true] %s1294_s12 }
  0x21   : > { %s1296_s13 = scalar_lea.hbm %s1295_s12, 8  ;;  %p1298_p9 = pneg %p1552_p8 }
  0x22   : > { %p1297_p7 = scmp.ne.s32.totalorder %s1295_s12, %s1296_s13  ;;  %p1302_p0 = scmp.lt.s32.totalorder %s1295_s12, %s1844_s0 }
  0x23   : > { %p1303_p2 = scmp.lt.s32.totalorder %s1301_s28, %s1296_s13 }
  0x24   : > { %p1299_p10 = pnand %p1298_p9, %p1297_p7 }
  0x25   : > { %p1304_p6 = por %p1303_p2, %p1302_p0 }
  0x26   : > { %p1300_p11 = pneg %p1299_p10 }
  0x28   : > { %p1305_p5 = pnand %p1304_p6, %p1300_p11 }
  0x2a   : > { %1308 = shalt.err (!%p1305_p5)
}
  0x2b   : > { %1083 = dma.hbm_to_vmem [thread:$0]  (!%p1552_p8), %s205_s7, 128, %s207_s9, %s194_s11  }
  0x2c   : > { %215 = sbr.rel (%p1491_p3) target bundleno = 699 (0x2bb), region = 36  ;;  %s1569_s26 = sand.u32 (!%p1491_p3), 1, %s1390_s16  }
  0x2d   : > { %s1042_s5 = sshll.u32 (!%p1491_p3), %s1569_s26, 3  ;;  %s218_s6 = scalar_lea.sflag (!%p1491_p3), [#allocation3], %s1569_s26 }
  0x2e   : > { %s221_s8 = scalar_lea.vmem (!%p1491_p3), [#allocation2], %s1042_s5 }
  0x31   : > { %1369 = dma.done.wait (%p1534_p12), %s218_s6, 128  }
  0x32   : > { %1371 = vsyncadd (%p1534_p12), %s218_s6, 4294967168 }
  0x33   : > { %1373 = dma.done.wait (%p43_p1), [#allocation6], 832  }
  0x34   : > { %1375 = vsyncadd (%p43_p1), [#allocation6], 4294966464 }
  0x35   : > { %1377 = dma.done.wait (%p43_p1), [#allocation9], 128  }
  0x36   : > { %1379 = vsyncadd (%p43_p1), [#allocation9], 4294967168  ;;  %v1405_v0 = vmov 2   ;;  %v1406_v1 = vmov 0   ;;  %v1407_v2 = vmov 13   ;;  %v1589_v4 = vld [vmem:[%s221_s8] sm:$0xff]  ;;  %v339_v24 = vlaneseq }
  0x37   : > { %1166 = vset.pattern.permute.xlu1 %v1405_v0  ;;  %1165 = vset.pattern.permute.xlu0 %v1406_v1  ;;  %v1587_v3 = vld [vmem:[#allocation7] sm:$0xf]  ;;  %542 = vst [vmem:[#allocation1] ss:$2 sm:$0xff] %v1589_v4  ;;  %v1408_v7 = vmov 3   ;;  %v1409_v8 = vmov 4  }
  0x38   : > { %1168 = vset.pattern.permute.xlu2 %v1407_v2  ;;  %294 = vperm.xlu1 %1166, %v1587_v3   ;;  %v1410_v9 = vmov 8   ;;  %v1411_v10 = vmov 1   ;;  %s1412_s23 = smov 127   ;;  %v1413_v11 = vmov 5   ;;  %s1414_s24 = smov 1   ;;  %v1415_v14 = vmov 6  }
  0x39   : > { %267 = vperm.xlu0 %1165, %v1587_v3   ;;  %322 = vperm.xlu2 %1168, %v1587_v3   ;;  %v1416_v15 = vmov 7   ;;  %v1417_v16 = vmov 9   ;;  %v537_v23 = vld [vmem:[#allocation5 + $0x23] ss:$8 sm:$0x3]  ;;  %v271_v25 = vperm.slane %v1589_v4, 0 }
  0x3a   : > { %v272_v26 = vperm.slane %v1589_v4, 4  ;;  %v283_v27 = vperm.slane %v1589_v4, 1  ;;  %v284_v28 = vperm.slane %v1589_v4, 5  ;;  %v297_v29 = vperm.slane %v1589_v4, 2  ;;  %s1418_s7 = smov 17   ;;  %s1419_s9 = smov 16  }
  0x3b   : > { %v298_v30 = vperm.slane %v1589_v4, 6  ;;  %v311_v31 = vperm.slane %v1589_v4, 3  ;;  %v312_v32 = vperm.slane %v1589_v4, 7  ;;  %vm538_vm0 = vcmp.gt.f32.partialorder %v537_v23, 0.5  ;;  %s1420_s10 = smov 15   ;;  %s1421_s11 = smov 112  }
  0x3c   : > { %v1628_v34 = vand.u32 127, %v339_v24  ;;  %v275_v35 = vperm.slane %v271_v25, 0  ;;  %v276_v36 = vperm.slane %v272_v26, 0  ;;  %v287_v37 = vperm.slane %v283_v27, 1  ;;  %s1422_s12 = smov 113   ;;  %s1427_s13 = smov 4  }
  0x3d   : > { %v288_v38 = vperm.slane %v284_v28, 1  ;;  %v301_v39 = vperm.slane %v297_v29, 2  ;;  %v302_v40 = vperm.slane %v298_v30, 2  ;;  %v564_v41 = vsel %vm538_vm0, 1, %v1406_v1  ;;  %v1665_v28 = vld [vmem:[#allocation8] sm:$0xff]  ;;  %s1428_s19 = smov 2  }
  0x3e   : > { %v543_v5 = vld.sshfl [vmem:[#allocation1] sm:$0xff pattern:$0x75316420]  ;;  %v544_v6 = vld.sshfl [vmem:[#allocation1 + $0x8] sm:$0xff pattern:$0x75316420] }
  0x3f   : > { %553 = vst [vmem:[#allocation1] ss:$2 sm:$0xff] %v1589_v4  ;;  %v315_v42 = vperm.slane %v311_v31, 3  ;;  %v316_v43 = vperm.slane %v312_v32, 3  ;;  %vm436_vm1 = vcmp.lt.s32.totalorder %v1628_v34, 127  ;;  %v565_v52 = vperm.slane %v564_v41, 0 }
  0x40   : > { %1167 = vset.pattern.permute.xlu1 %v1408_v7  ;;  %v566_v53 = vperm.slane %v564_v41, 1  ;;  %vm412_vm2 = vcmp.lt.s32.totalorder %v1628_v34, 1  ;;  %vm574_vm5 = vcmask 1043456   ;;  %v1423_v30 = vmov 10   ;;  %s1429_s20 = smov 124   ;;  %s1430_s28 = smov 126  }
  0x41   : > { %1170 = vset.pattern.permute.xlu0 %v1409_v8  ;;  %308 = vperm.xlu1 %1167, %v1587_v3   ;;  %vm1637_vm3 = vcmp.eq.s32.totalorder %v565_v52, 1  ;;  %v1425_v32 = vmov 11   ;;  %vm341_vm6 = vcmp.lt.s32.totalorder %v1628_v34, 17  ;;  %vm364_vm7 = vcmp.lt.s32.totalorder %v1628_v34, 16  ;;  %s1432_s29 = smov 32   ;;  %s1433_s30 = smov 64  }
  0x42   : > { %353 = vperm.xlu0 %1170, %v1587_v3   ;;  %1169 = vset.pattern.permute.xlu2 %v1410_v9  ;;  %vm568_vm4 = vcmp.eq.s32.totalorder %v566_v53, 1  ;;  %vm388_vm8 = vcmp.lt.s32.totalorder %v1628_v34, 15  ;;  %vm460_vm9 = vcmp.lt.s32.totalorder %v1628_v34, 113  ;;  %vm484_vm11 = vcmp.lt.s32.totalorder %v1628_v34, 112  ;;  %s1434_s5 = smov 96   ;;  %s1435_s6 = smov 111  }
  0x43   : > { %330 = vperm.xlu2 %1169, %v1587_v3   ;;  %vm687_vm14 = vcmp.lt.s32.totalorder %v1628_v34, 4  ;;  %vm711_vm15 = vcmp.lt.s32.totalorder %v1628_v34, 2  ;;  %vm735_vm0 = vcmp.lt.s32.totalorder %v1628_v34, 126  ;;  %s1046_s8 = sshll.u32 %s1569_s26, 4 }
  0x46   : > { %v554_v12 = vld.sshfl [vmem:[#allocation1] sm:$0xff pattern:$0x75316420]  ;;  %v555_v13 = vld.sshfl [vmem:[#allocation1 + $0x8] sm:$0xff pattern:$0x75316420] }
  0x49   : > { %547 = vrot.lane.b32.xlu1 %v543_v5, %s1412_s23 }
  0x4a   : > { %1171 = vset.pattern.permute.xlu0 %v1411_v10  ;;  %1177 = vset.pattern.permute.xlu1 %v1405_v0 }
  0x4b   : > { %280 = vperm.xlu0 %1171, %v1587_v3   ;;  %549 = vrot.lane.b32.xlu2 %v544_v6, %s1412_s23 }
  0x4c   : > { %1172 = vset.pattern.permute.xlu2 %v1413_v11 }
  0x51   : > { %558 = vrot.lane.b32.xlu1 %v554_v12, %s1414_s24 }
  0x53   : > { %560 = vrot.lane.b32.xlu2 %v555_v13, %s1414_s24 }
  0x5b   : > { %377 = vperm.xlu2 %1172, %v1587_v3  }
  0x63   : > { %1173 = vset.pattern.permute.xlu2 %v1415_v14 }
  0x64   : > { %401 = vperm.xlu2 %1173, %v1587_v3  }
  0x6c   : > { %1174 = vset.pattern.permute.xlu2 %v1416_v15 }
  0x6d   : > { %425 = vperm.xlu2 %1174, %v1587_v3  }
  0x75   : > { %1175 = vset.pattern.permute.xlu2 %v1417_v16 }
  0x76   : > { %449 = vperm.xlu2 %1175, %v1587_v3  }
  0x7e   : > { %1176 = vset.pattern.permute.xlu2 %v1406_v1 }
  0x93   : > { %v323_v17 = vpop.permute.xlu2 %322 }
  0x9d   : > { %v1616_v20 = vpop.permute.xlu2 %330 }
  0xa5   : > { %v550_v33 = vpop.permute.xlu2 %549 }
  0xaa   : > { %v295_v19 = vpop.permute.xlu1 %294 }
  0xab   : > { %v268_v18 = vpop.permute.xlu0 %267  ;;  %v303_v50 = vmul.f32 %v301_v39, %v295_v19  ;;  %v304_v51 = vmul.f32 %v302_v40, %v295_v19 }
  0xac   : > { %v277_v46 = vmul.f32 %v275_v35, %v268_v18  ;;  %v278_v47 = vmul.f32 %v276_v36, %v268_v18  ;;  %v344_v36 = vld [vmem:[#allocation5] ss:$8 sm:$0x3] }
  0xad   : > { %v561_v60 = vpop.permute.xlu2 %560 }
  0xb3   : > { %v309_v21 = vpop.permute.xlu1 %308 }
  0xb4   : > { %v1618_v22 = vpop.permute.xlu0 %353  ;;  %v317_v54 = vmul.f32 %v315_v42, %v309_v21  ;;  %v318_v55 = vmul.f32 %v316_v43, %v309_v21 }
  0xb5   : > { %v378_v31 = vpop.permute.xlu2 %377 }
  0xbb   : > { %v548_v44 = vpop.permute.xlu1 %547 }
  0xbc   : > { %v551_v61 = vsel %vm436_vm1, %v548_v44, %v550_v33  ;;  %v552_v62 = vsel %vm436_vm1, %v550_v33, %v548_v44 }
  0xbd   : > { %v281_v45 = vpop.permute.xlu0 %280 }
  0xbe   : > { %v289_v48 = vmul.f32 %v287_v37, %v281_v45  ;;  %v290_v49 = vmul.f32 %v288_v38, %v281_v45  ;;  %v402_v33 = vpop.permute.xlu2 %401  ;;  %v346_v37 = vperm.slane %v344_v36, 0  ;;  %v368_v45 = vld [vmem:[#allocation5 + $0x1] ss:$8 sm:$0x3] }
  0xbf   : > { %v371_v52 = vperm.slane %v368_v45, 1 }
  0xc0   : > { %v291_v56 = vadd.f32 %v289_v48, %v277_v46  ;;  %v292_v57 = vadd.f32 %v290_v49, %v278_v47 }
  0xc2   : > { %v305_v58 = vadd.f32 %v303_v50, %v291_v56  ;;  %v306_v59 = vadd.f32 %v304_v51, %v292_v57  ;;  %v370_v51 = vperm.slane %v368_v45, 0 }
  0xc3   : > { %v559_v6 = vpop.permute.xlu1 %558 }
  0xc4   : > { %v319_v0 = vadd.f32 %v317_v54, %v305_v58  ;;  %v320_v5 = vadd.f32 %v318_v55, %v306_v59  ;;  %v562_v10 = vsel %vm412_vm2, %v559_v6, %v561_v60  ;;  %v563_v12 = vsel %vm412_vm2, %v561_v60, %v559_v6  ;;  %v392_v59 = vld [vmem:[#allocation5 + $0x2] ss:$8 sm:$0x3] }
  0xc5   : > { %v569_v19 = vsel %vm1637_vm3, %v551_v61, %v563_v12  ;;  %v570_v21 = vsel %vm568_vm4, %v552_v62, %v562_v10  ;;  %v394_v63 = vperm.slane %v392_v59, 0  ;;  %vm819_vm3 = vcmp.lt.s32.totalorder %v1628_v34, 32 }
  0xc6   : > { %v325_v13 = vadd.f32 %v323_v17, %v319_v0  ;;  %v326_v18 = vadd.f32 %v323_v17, %v320_v5  ;;  %v573_v23 = vrot.slane %v570_v21, 4  ;;  %v395_v0 = vperm.slane %v392_v59, 1 }
  0xc7   : > { %vm843_vm4 = vcmp.lt.s32.totalorder %v1628_v34, 96 }
  0xc8   : > { %v1647_v24 = vmax.f32 %v325_v13, 0.0  ;;  %v1649_v25 = vmax.f32 %v326_v18, 0.0  ;;  %v575_v26 = vsel %vm574_vm5, %v569_v19, %v573_v23  ;;  %v416_v19 = vld [vmem:[#allocation5 + $0x3] ss:$8 sm:$0x3] }
  0xc9   : > { %v1653_v27 = vadd.f32 %v575_v26, %v1589_v4 }
  0xca   : > { %337 = vrot.lane.b32.xlu2 %v1649_v25, %s1418_s7  ;;  %360 = vrot.lane.b32.xlu0 %v1647_v24, %s1419_s9  ;;  %v333_v46 = vmul.f32 %v1616_v20, %v1647_v24 }
  0xcb   : > { %335 = vrot.lane.b32.xlu1 %v1647_v24, %s1418_s7  ;;  %579 = vst [vmem:[#allocation1] ss:$2 sm:$0xff] %v1653_v27 }
  0xd2   : > { %384 = vrot.lane.b32.xlu0 %v1647_v24, %s1420_s10  ;;  %v580_v17 = vld.sshfl [vmem:[#allocation1] sm:$0xff pattern:$0x75316420]  ;;  %v581_v4 = vld.sshfl [vmem:[#allocation1 + $0x8] sm:$0xff pattern:$0x75316420] }
  0xd3   : > { %362 = vrot.lane.b32.xlu1 %v1649_v25, %s1419_s9  ;;  %590 = vst [vmem:[#allocation1] ss:$2 sm:$0xff] %v1653_v27  ;;  %586 = vrot.lane.b32.xlu2 %v581_v4, %s1421_s11 }
  0xda   : > { %408 = vrot.lane.b32.xlu0 %v1647_v24, %s1414_s24  ;;  %v591_v29 = vld.sshfl [vmem:[#allocation1] sm:$0xff pattern:$0x75316420] }
  0xdb   : > { %386 = vrot.lane.b32.xlu1 %v1649_v25, %s1420_s10  ;;  %617 = vperm.xlu2 %1176, %v1665_v28   ;;  %s261_s10 = scalar_lea.vmem [#allocation10], %s1046_s8 }
  0xe2   : > { %432 = vrot.lane.b32.xlu0 %v1647_v24, %s1412_s23 }
  0xe3   : > { %410 = vrot.lane.b32.xlu1 %v1649_v25, %s1414_s24  ;;  %1178 = vset.pattern.permute.xlu2 %v1408_v7  ;;  %v592_v7 = vld.sshfl [vmem:[#allocation1 + $0x8] sm:$0xff pattern:$0x75316420] }
  0xe4   : > { %658 = vperm.xlu2 %1178, %v1665_v28  }
  0xea   : > { %456 = vrot.lane.b32.xlu0 %v1647_v24, %s1422_s12 }
  0xeb   : > { %434 = vrot.lane.b32.xlu1 %v1649_v25, %s1412_s23  ;;  %s1053_s23 = sshll.u32 %s1486_s22, 4  ;;  %s930_s22 = sshll.u32 %s261_s10, 4  ;;  %s931_s22 = int_to_ptr.vmem [resolvable:$true] %s930_s22 }
  0xec   : > { %458 = vrot.lane.b32.xlu2 %v1649_v25, %s1422_s12  ;;  %s917_s12 = scalar_lea.sflag [#allocation4], %s1569_s26 }
  0xed   : > { %1184 = vset.pattern.permute.xlu2 %v1413_v11  ;;  %v1424_v11 = vmov 14  }
  0xf2   : > { %595 = vrot.lane.b32.xlu0 %v591_v29, %s1419_s9  ;;  %v418_v29 = vperm.slane %v416_v19, 0 }
  0xf3   : > { %584 = vrot.lane.b32.xlu1 %v580_v17, %s1421_s11 }
  0xf4   : > { %482 = vrot.lane.b32.xlu2 %v1649_v25, %s1421_s11 }
  0xfa   : > { %630 = vperm.xlu0 %1171, %v1665_v28  }
  0xfb   : > { %597 = vrot.lane.b32.xlu1 %v592_v7, %s1419_s9  ;;  %v419_v7 = vperm.slane %v416_v19, 1  ;;  %s928_s9 = scalar_lea.hbm %s1848_s4, %s1053_s23 }
  0xfc   : > { %724 = vperm.xlu2 %1184, %v1665_v28  }
 0x102   : > { %1180 = vset.pattern.permute.xlu0 %v1423_v30 }
 0x103   : > { %644 = vperm.xlu1 %1177, %v1665_v28   ;;  %473 = vperm.xlu0 %1180, %v1587_v3  }
 0x104   : > { %1185 = vset.pattern.permute.xlu2 %v1416_v15  ;;  %v1702_v15 = vpop.permute.xlu2 %425 }
 0x10b   : > { %1179 = vset.pattern.permute.xlu1 %v1424_v11  ;;  %1182 = vset.pattern.permute.xlu0 %v1415_v14 }
 0x10c   : > { %672 = vperm.xlu1 %1179, %v1665_v28   ;;  %678 = vperm.xlu0 %1182, %v1665_v28   ;;  %v1706_v14 = vpop.permute.xlu2 %449 }
 0x114   : > { %480 = vrot.lane.b32.xlu1 %v1647_v24, %s1421_s11  ;;  %1186 = vset.pattern.permute.xlu0 %v1410_v9  ;;  %v347_v9 = vperm.slane %v344_v36, 1  ;;  %s932_s11 = sshll.u32 %s928_s9, 4  ;;  %s933_s11 = int_to_ptr.hbm [resolvable:$true] %s932_s11 }
 0x115   : > { %1181 = vset.pattern.permute.xlu1 %v1425_v32 }
 0x11c   : > { %497 = vperm.xlu1 %1181, %v1587_v3  }
 0x124   : > { %1183 = vset.pattern.permute.xlu1 %v1409_v8  ;;  %v338_v35 = vpop.permute.xlu2 %337  ;;  %v334_v8 = vmul.f32 %v1616_v20, %v1649_v25 }
 0x125   : > { %700 = vperm.xlu1 %1183, %v1665_v28  }
 0x12d   : > { %v1709_v40 = vpop.permute.xlu2 %586 }
 0x135   : > { %v1722_v58 = vpop.permute.xlu2 %617 }
 0x13c   : > { %v361_v38 = vpop.permute.xlu0 %360 }
 0x13d   : > { %v336_v39 = vpop.permute.xlu1 %335 }
 0x13e   : > { %v342_v41 = vsel %vm341_vm6, %v336_v39, %v338_v35  ;;  %v343_v42 = vsel %vm341_vm6, %v338_v35, %v336_v39  ;;  %v1725_v26 = vpop.permute.xlu2 %658  ;;  %v440_v39 = vld [vmem:[#allocation5 + $0x5] ss:$8 sm:$0x3] }
 0x13f   : > { %v350_v43 = vmul.f32 %v346_v37, %v343_v42  ;;  %v351_v44 = vmul.f32 %v347_v9, %v342_v41  ;;  %v443_v45 = vperm.slane %v440_v39, 1 }
 0x141   : > { %v356_v47 = vmul.f32 %v1618_v22, %v350_v43  ;;  %v357_v48 = vmul.f32 %v1618_v22, %v351_v44  ;;  %v442_v44 = vperm.slane %v440_v39, 0 }
 0x143   : > { %v358_v49 = vadd.f32 %v356_v47, %v333_v46  ;;  %v359_v50 = vadd.f32 %v357_v48, %v334_v8 }
 0x144   : > { %v385_v53 = vpop.permute.xlu0 %384 }
 0x145   : > { %v363_v54 = vpop.permute.xlu1 %362 }
 0x146   : > { %v365_v55 = vsel %vm364_vm7, %v361_v38, %v363_v54  ;;  %v366_v56 = vsel %vm364_vm7, %v363_v54, %v361_v38  ;;  %v459_v8 = vpop.permute.xlu2 %458 }
 0x147   : > { %v374_v57 = vmul.f32 %v370_v51, %v366_v56  ;;  %v375_v20 = vmul.f32 %v371_v52, %v365_v55  ;;  %v540_v52 = vld [vmem:[#allocation5 + $0x24] ss:$8 sm:$0x3] }
 0x148   : > { %vm541_vm10 = vcmp.gt.f32.partialorder %v540_v52, 0.5 }
 0x149   : > { %v380_v22 = vmul.f32 %v378_v31, %v374_v57  ;;  %v381_v60 = vmul.f32 %v378_v31, %v375_v20  ;;  %v601_v59 = vsel %vm541_vm10, 1, %v1406_v1 }
 0x14b   : > { %v382_v61 = vadd.f32 %v380_v22, %v358_v49  ;;  %v383_v62 = vadd.f32 %v381_v60, %v359_v50  ;;  %v603_v60 = vperm.slane %v601_v59, 1 }
 0x14c   : > { %v409_v5 = vpop.permute.xlu0 %408 }
 0x14d   : > { %v387_v6 = vpop.permute.xlu1 %386  ;;  %vm605_vm12 = vcmp.eq.s32.totalorder %v603_v60, 1 }
 0x14e   : > { %v389_v10 = vsel %vm388_vm8, %v385_v53, %v387_v6  ;;  %v390_v12 = vsel %vm388_vm8, %v387_v6, %v385_v53 }
 0x14f   : > { %v398_v13 = vmul.f32 %v394_v63, %v390_v12  ;;  %v399_v18 = vmul.f32 %v395_v0, %v389_v10  ;;  %v464_v63 = vld [vmem:[#allocation5 + $0x6] ss:$8 sm:$0x3] }
 0x150   : > { %v466_v10 = vperm.slane %v464_v63, 0  ;;  %v467_v12 = vperm.slane %v464_v63, 1 }
 0x151   : > { %v404_v21 = vmul.f32 %v402_v33, %v398_v13  ;;  %v405_v23 = vmul.f32 %v402_v33, %v399_v18 }
 0x153   : > { %v406_v17 = vadd.f32 %v404_v21, %v382_v61  ;;  %v407_v4 = vadd.f32 %v405_v23, %v383_v62  ;;  %v602_v61 = vperm.slane %v601_v59, 0 }
 0x154   : > { %v433_v31 = vpop.permute.xlu0 %432 }
 0x155   : > { %v411_v35 = vpop.permute.xlu1 %410  ;;  %vm604_vm13 = vcmp.eq.s32.totalorder %v602_v61, 1 }
 0x156   : > { %v413_v36 = vsel %vm412_vm2, %v409_v5, %v411_v35  ;;  %v414_v37 = vsel %vm412_vm2, %v411_v35, %v409_v5  ;;  %vm795_vm2 = vcmp.lt.s32.totalorder %v1628_v34, 64 }
 0x157   : > { %v422_v9 = vmul.f32 %v418_v29, %v414_v37  ;;  %v423_v38 = vmul.f32 %v419_v7, %v413_v36 }
 0x159   : > { %v428_v41 = vmul.f32 %v1702_v15, %v422_v9  ;;  %v429_v33 = vmul.f32 %v1702_v15, %v423_v38 }
 0x15b   : > { %v430_v42 = vadd.f32 %v428_v41, %v406_v17  ;;  %v431_v43 = vadd.f32 %v429_v33, %v407_v4  ;;  %v1426_v41 = vmov 15  }
 0x15c   : > { %v457_v46 = vpop.permute.xlu0 %456  ;;  %1187 = vset.pattern.permute.xlu1 %v1426_v41 }
 0x15d   : > { %v461_v47 = vsel %vm460_vm9, %v457_v46, %v459_v8  ;;  %v462_v48 = vsel %vm460_vm9, %v459_v8, %v457_v46  ;;  %v435_v49 = vpop.permute.xlu1 %434 }
 0x15e   : > { %v437_v50 = vsel %vm436_vm1, %v433_v31, %v435_v49  ;;  %v438_v51 = vsel %vm436_vm1, %v435_v49, %v433_v31  ;;  %v470_v17 = vmul.f32 %v466_v10, %v461_v47  ;;  %v471_v4 = vmul.f32 %v467_v12, %v462_v48 }
 0x15f   : > { %v446_v53 = vmul.f32 %v442_v44, %v437_v50  ;;  %v447_v15 = vmul.f32 %v443_v45, %v438_v51  ;;  %vm759_vm1 = vcmp.lt.s32.totalorder %v1628_v34, 124 }
 0x161   : > { %v452_v54 = vmul.f32 %v1706_v14, %v446_v53  ;;  %v453_v55 = vmul.f32 %v1706_v14, %v447_v15 }
 0x163   : > { %v454_v56 = vadd.f32 %v452_v54, %v430_v42  ;;  %v455_v57 = vadd.f32 %v453_v55, %v431_v43 }
 0x164   : > { %v596_v20 = vpop.permute.xlu0 %595 }
 0x165   : > { %v585_v22 = vpop.permute.xlu1 %584 }
 0x166   : > { %v589_v5 = vsel %vm484_vm11, %v1709_v40, %v585_v22  ;;  %v588_v13 = vsel %vm484_vm11, %v585_v22, %v1709_v40 }
 0x16c   : > { %v631_v62 = vpop.permute.xlu0 %630 }
 0x16d   : > { %v598_v0 = vpop.permute.xlu1 %597 }
 0x16e   : > { %v599_v14 = vsel %vm364_vm7, %v596_v20, %v598_v0  ;;  %v600_v1 = vsel %vm364_vm7, %v598_v0, %v596_v20 }
 0x16f   : > { %v607_v6 = vsel %vm605_vm12, %v589_v5, %v599_v14  ;;  %v606_v19 = vsel %vm604_vm13, %v588_v13, %v600_v1  ;;  %v488_v1 = vld [vmem:[#allocation5 + $0x7] ss:$8 sm:$0x3] }
 0x170   : > { %v610_v18 = vrot.slane %v607_v6, 4  ;;  %v490_v12 = vperm.slane %v488_v1, 0  ;;  %v491_v13 = vperm.slane %v488_v1, 1 }
 0x172   : > { %v611_v21 = vsel %vm574_vm5, %v606_v19, %v610_v18  ;;  %vm508_vm5 = vcmp.lt.s32.totalorder %v1628_v34, 111 }
 0x173   : > { %v613_v23 = vadd.f32 %v611_v21, %v1653_v27 }
 0x175   : > { %v614_v29 = vmul.f32 0.25, %v613_v23  ;;  %v474_v7 = vpop.permute.xlu0 %473  ;;  %v645_v31 = vpop.permute.xlu1 %644 }
 0x176   : > { %v476_v35 = vmul.f32 %v474_v7, %v470_v17  ;;  %v477_v36 = vmul.f32 %v474_v7, %v471_v4 }
 0x177   : > { %v621_v37 = vperm.slane %v614_v29, 0  ;;  %v622_v9 = vperm.slane %v614_v29, 4  ;;  %v633_v38 = vperm.slane %v614_v29, 1  ;;  %v634_v39 = vperm.slane %v614_v29, 5 }
 0x178   : > { %v478_v40 = vadd.f32 %v476_v35, %v454_v56  ;;  %v479_v33 = vadd.f32 %v477_v36, %v455_v57  ;;  %v647_v42 = vperm.slane %v614_v29, 2  ;;  %v648_v43 = vperm.slane %v614_v29, 6 }
 0x179   : > { %v625_v44 = vperm.slane %v621_v37, 0  ;;  %v626_v45 = vperm.slane %v622_v9, 0  ;;  %v637_v27 = vperm.slane %v633_v38, 1  ;;  %v638_v8 = vperm.slane %v634_v39, 1 }
 0x17a   : > { %v651_v46 = vperm.slane %v647_v42, 2  ;;  %v652_v47 = vperm.slane %v648_v43, 2  ;;  %v661_v48 = vperm.slane %v614_v29, 3  ;;  %v662_v49 = vperm.slane %v614_v29, 7 }
 0x17b   : > { %v627_v50 = vmul.f32 %v625_v44, %v1722_v58  ;;  %v628_v51 = vmul.f32 %v626_v45, %v1722_v58  ;;  %v639_v52 = vmul.f32 %v637_v27, %v631_v62  ;;  %v640_v53 = vmul.f32 %v638_v8, %v631_v62  ;;  %v483_v62 = vpop.permute.xlu2 %482  ;;  %v691_v9 = vld [vmem:[#allocation5 + $0x11] ss:$8 sm:$0x3]  ;;  %v739_v43 = vld [vmem:[#allocation5 + $0x14] ss:$8 sm:$0x3] }
 0x17c   : > { %v665_v15 = vperm.slane %v661_v48, 3  ;;  %v666_v54 = vperm.slane %v662_v49, 3  ;;  %v653_v57 = vmul.f32 %v651_v46, %v645_v31  ;;  %v654_v20 = vmul.f32 %v652_v47, %v645_v31 }
 0x17d   : > { %v641_v55 = vadd.f32 %v639_v52, %v627_v50  ;;  %v642_v56 = vadd.f32 %v640_v53, %v628_v51  ;;  %v693_v39 = vperm.slane %v691_v9, 0  ;;  %v694_v41 = vperm.slane %v691_v9, 1 }
 0x17e   : > { %v673_v59 = vpop.permute.xlu1 %672  ;;  %v667_v61 = vmul.f32 %v665_v15, %v1725_v26  ;;  %v668_v63 = vmul.f32 %v666_v54, %v1725_v26  ;;  %v679_v36 = vpop.permute.xlu0 %678  ;;  %v741_v8 = vperm.slane %v739_v43, 0  ;;  %v742_v46 = vperm.slane %v739_v43, 1 }
 0x17f   : > { %v655_v22 = vadd.f32 %v653_v57, %v641_v55  ;;  %v656_v60 = vadd.f32 %v654_v20, %v642_v56  ;;  %v763_v56 = vld [vmem:[#allocation5 + $0x15] ss:$8 sm:$0x3] }
 0x181   : > { %v669_v0 = vadd.f32 %v667_v61, %v655_v22  ;;  %v670_v5 = vadd.f32 %v668_v63, %v656_v60 }
 0x183   : > { %v1758_v14 = vadd.f32 %v673_v59, %v669_v0  ;;  %v1760_v58 = vadd.f32 %v673_v59, %v670_v5  ;;  %v725_v7 = vpop.permute.xlu2 %724  ;;  %v765_v0 = vperm.slane %v763_v56, 0  ;;  %v766_v5 = vperm.slane %v763_v56, 1 }
 0x185   : > { %685 = vrot.lane.b32.xlu0 %v1760_v58, %s1427_s13  ;;  %707 = vrot.lane.b32.xlu1 %v1758_v14, %s1428_s19  ;;  %v681_v54 = vmul.f32 %v679_v36, %v1758_v14  ;;  %v682_v55 = vmul.f32 %v679_v36, %v1760_v58 }
 0x186   : > { %683 = vrot.lane.b32.xlu2 %v1758_v14, %s1427_s13  ;;  %v481_v6 = vpop.permute.xlu1 %480  ;;  %s1338_s13 = sshra.s32 %s933_s11, 4  ;;  %s1339_s13 = int_to_ptr.hbm [resolvable:$true] %s1338_s13 }
 0x187   : > { %v485_v26 = vsel %vm484_vm11, %v481_v6, %v483_v62  ;;  %v486_v10 = vsel %vm484_vm11, %v483_v62, %v481_v6  ;;  %p1345_p12 = scmp.lt.s32.totalorder %s1339_s13, %s1848_s4 }
 0x188   : > { %v494_v18 = vmul.f32 %v490_v12, %v485_v26  ;;  %v495_v19 = vmul.f32 %v491_v13, %v486_v10 }
 0x18d   : > { %755 = vrot.lane.b32.xlu0 %v1758_v14, %s1429_s20  ;;  %733 = vrot.lane.b32.xlu1 %v1760_v58, %s1430_s28 }
 0x18e   : > { %709 = vrot.lane.b32.xlu2 %v1760_v58, %s1428_s19  ;;  %v498_v21 = vpop.permute.xlu1 %497  ;;  %s1340_s19 = scalar_lea.hbm %s1339_s13, 16 }
 0x18f   : > { %v500_v23 = vmul.f32 %v498_v21, %v494_v18  ;;  %v501_v17 = vmul.f32 %v498_v21, %v495_v19  ;;  %p1341_p1 = scmp.ne.s32.totalorder %s1339_s13, %s1340_s19 }
 0x191   : > { %v1772_v4 = vadd.f32 %v500_v23, %v478_v40  ;;  %v1774_v29 = vadd.f32 %v501_v17, %v479_v33  ;;  %v715_v33 = vld [vmem:[#allocation5 + $0x12] ss:$8 sm:$0x3]  ;;  %p1342_p3 = pnand %p1341_p1, %p1538_p13 }
 0x192   : > { %v717_v45 = vperm.slane %v715_v33, 0  ;;  %v718_v27 = vperm.slane %v715_v33, 1  ;;  %v799_v33 = vld [vmem:[#allocation5 + $0x16] ss:$8 sm:$0x3] }
 0x193   : > { %p1343_p5 = pneg %p1342_p3 }
 0x195   : > { %757 = vrot.lane.b32.xlu1 %v1760_v58, %s1429_s20  ;;  %772 = vperm.xlu0 %1186, %v1665_v28  }
 0x196   : > { %731 = vrot.lane.b32.xlu2 %v1758_v14, %s1430_s28 }
 0x197   : > { %v701_v35 = vpop.permute.xlu1 %700 }
 0x19d   : > { %780 = vperm.xlu1 %1187, %v1665_v28  }
 0x19e   : > { %748 = vperm.xlu2 %1185, %v1665_v28  }
 0x1a5   : > { %1188 = vset.pattern.permute.xlu1 %v1425_v32 }
 0x1a6   : > { %786 = vperm.xlu1 %1188, %v1665_v28   ;;  %1189 = vset.pattern.permute.xlu2 %v1417_v16 }
 0x1a7   : > { %808 = vperm.xlu2 %1189, %v1665_v28  }
 0x1ae   : > { %1192 = vset.pattern.permute.xlu1 %v1407_v2 }
 0x1af   : > { %1190 = vset.pattern.permute.xlu2 %v1423_v30  ;;  %v1431_v30 = vmov 12  }
 0x1b0   : > { %1191 = vset.pattern.permute.xlu0 %v1431_v30 }
 0x1e0   : > { %v684_v31 = vpop.permute.xlu2 %683 }
 0x1e8   : > { %v710_v37 = vpop.permute.xlu2 %709 }
 0x1f0   : > { %v732_v42 = vpop.permute.xlu2 %731 }
 0x1f7   : > { %v686_v38 = vpop.permute.xlu0 %685  ;;  %v708_v32 = vpop.permute.xlu1 %707 }
 0x1f8   : > { %v688_v40 = vsel %vm687_vm14, %v684_v31, %v686_v38  ;;  %v689_v16 = vsel %vm687_vm14, %v686_v38, %v684_v31  ;;  %v712_v48 = vsel %vm711_vm15, %v708_v32, %v710_v37  ;;  %v713_v49 = vsel %vm711_vm15, %v710_v37, %v708_v32  ;;  %v749_v60 = vpop.permute.xlu2 %748 }
 0x1f9   : > { %v697_v2 = vmul.f32 %v693_v39, %v689_v16  ;;  %v698_v44 = vmul.f32 %v694_v41, %v688_v40  ;;  %v721_v57 = vmul.f32 %v717_v45, %v713_v49  ;;  %v722_v20 = vmul.f32 %v718_v27, %v712_v48  ;;  %v823_v45 = vld [vmem:[#allocation5 + $0x17] ss:$8 sm:$0x3] }
 0x1fb   : > { %v703_v53 = vmul.f32 %v701_v35, %v697_v2  ;;  %v704_v15 = vmul.f32 %v701_v35, %v698_v44  ;;  %v727_v62 = vmul.f32 %v725_v7, %v721_v57  ;;  %v728_v1 = vmul.f32 %v725_v7, %v722_v20 }
 0x1fc   : > { %v1436_v7 = vmov 16   ;;  %v801_v2 = vperm.slane %v799_v33, 0  ;;  %v802_v44 = vperm.slane %v799_v33, 1 }
 0x1fd   : > { %v705_v61 = vadd.f32 %v703_v53, %v681_v54  ;;  %v706_v63 = vadd.f32 %v704_v15, %v682_v55 }
 0x1ff   : > { %v734_v47 = vpop.permute.xlu1 %733  ;;  %v756_v50 = vpop.permute.xlu0 %755  ;;  %v729_v13 = vadd.f32 %v727_v62, %v705_v61  ;;  %v730_v18 = vadd.f32 %v728_v1, %v706_v63 }
 0x200   : > { %v736_v51 = vsel %vm735_vm0, %v732_v42, %v734_v47  ;;  %v737_v52 = vsel %vm735_vm0, %v734_v47, %v732_v42 }
 0x201   : > { %v745_v59 = vmul.f32 %v741_v8, %v736_v51  ;;  %v746_v22 = vmul.f32 %v742_v46, %v737_v52  ;;  %v809_v39 = vpop.permute.xlu2 %808  ;;  %v825_v8 = vperm.slane %v823_v45, 0  ;;  %v826_v46 = vperm.slane %v823_v45, 1  ;;  %v864_v52 = vld [vmem:[#allocation5 + $0x22] ss:$8 sm:$0x3] }
 0x203   : > { %v751_v6 = vmul.f32 %v749_v60, %v745_v59  ;;  %v752_v26 = vmul.f32 %v749_v60, %v746_v22  ;;  %v866_v22 = vperm.slane %v864_v52, 0  ;;  %v867_v60 = vperm.slane %v864_v52, 1 }
 0x205   : > { %v753_v23 = vadd.f32 %v751_v6, %v729_v13  ;;  %v754_v17 = vadd.f32 %v752_v26, %v730_v18 }
 0x207   : > { %v758_v10 = vpop.permute.xlu1 %757  ;;  %v773_v58 = vpop.permute.xlu0 %772 }
 0x208   : > { %v760_v14 = vsel %vm759_vm1, %v756_v50, %v758_v10  ;;  %v761_v12 = vsel %vm759_vm1, %v758_v10, %v756_v50  ;;  %v847_v50 = vld [vmem:[#allocation5 + $0x21] ss:$8 sm:$0x3] }
 0x209   : > { %v769_v19 = vmul.f32 %v765_v0, %v760_v14  ;;  %v770_v21 = vmul.f32 %v766_v5, %v761_v12  ;;  %v849_v20 = vperm.slane %v847_v50, 0  ;;  %v850_v59 = vperm.slane %v847_v50, 1 }
 0x20b   : > { %v775_v31 = vmul.f32 %v773_v58, %v769_v19  ;;  %v776_v35 = vmul.f32 %v773_v58, %v770_v21 }
 0x20d   : > { %v777_v36 = vadd.f32 %v775_v31, %v753_v23  ;;  %v778_v37 = vadd.f32 %v776_v35, %v754_v17 }
 0x20f   : > { %v781_v9 = vpop.permute.xlu1 %780 }
 0x210   : > { %v783_v38 = vadd.f32 %v781_v9, %v777_v36  ;;  %v784_v32 = vadd.f32 %v781_v9, %v778_v37 }
 0x212   : > { %817 = vrot.lane.b32.xlu0 %v784_v32, %s1432_s29  ;;  %793 = vrot.lane.b32.xlu1 %v784_v32, %s1433_s30 }
 0x213   : > { %791 = vrot.lane.b32.xlu2 %v783_v38, %s1433_s30 }
 0x218   : > { %v787_v40 = vpop.permute.xlu1 %786 }
 0x219   : > { %v789_v54 = vmul.f32 %v787_v40, %v783_v38  ;;  %v790_v55 = vmul.f32 %v787_v40, %v784_v32 }
 0x21a   : > { %841 = vrot.lane.b32.xlu1 %v784_v32, %s1434_s5  ;;  %839 = vrot.lane.b32.xlu0 %v783_v38, %s1434_s5 }
 0x21b   : > { %815 = vrot.lane.b32.xlu2 %v783_v38, %s1432_s29  ;;  %v512_v38 = vld [vmem:[#allocation5 + $0x10] ss:$8 sm:$0x3]  ;;  %s1344_s29 = scalar_lea.hbm %s1848_s4, 32 }
 0x21c   : > { %v514_v33 = vperm.slane %v512_v38, 0  ;;  %p1346_p8 = scmp.lt.s32.totalorder %s1344_s29, %s1340_s19 }
 0x21e   : > { %p1347_p7 = por %p1346_p8, %p1345_p12 }
 0x220   : > { %p1348_p9 = pnand %p1347_p7, %p1343_p5 }
 0x222   : > { %873 = vperm.xlu1 %1192, %v1665_v28   ;;  %856 = vperm.xlu0 %1191, %v1665_v28  }
 0x223   : > { %832 = vperm.xlu2 %1190, %v1665_v28  }
 0x22a   : > { %504 = vrot.lane.b32.xlu1 %v1647_v24, %s1435_s6  ;;  %521 = vperm.xlu0 %1191, %v1587_v3  }
 0x22b   : > { %1193 = vset.pattern.permute.xlu2 %v1436_v7  ;;  %1194 = vset.pattern.permute.xlu1 %v1424_v11 }
 0x22c   : > { %881 = vperm.xlu2 %1193, %v1665_v28  }
 0x232   : > { %529 = vperm.xlu1 %1194, %v1587_v3   ;;  %1195 = vset.pattern.permute.xlu0 %v1436_v7 }
 0x234   : > { %506 = vrot.lane.b32.xlu2 %v1649_v25, %s1435_s6 }
 0x26d   : > { %v792_v41 = vpop.permute.xlu2 %791 }
 0x275   : > { %v816_v16 = vpop.permute.xlu2 %815 }
 0x27d   : > { %v833_v28 = vpop.permute.xlu2 %832 }
 0x284   : > { %v818_v42 = vpop.permute.xlu0 %817  ;;  %v794_v43 = vpop.permute.xlu1 %793 }
 0x285   : > { %v796_v30 = vsel %vm795_vm2, %v792_v41, %v794_v43  ;;  %v797_v11 = vsel %vm795_vm2, %v794_v43, %v792_v41  ;;  %v820_v47 = vsel %vm819_vm3, %v816_v16, %v818_v42  ;;  %v821_v48 = vsel %vm819_vm3, %v818_v42, %v816_v16 }
 0x286   : > { %v805_v3 = vmul.f32 %v801_v2, %v797_v11  ;;  %v806_v27 = vmul.f32 %v802_v44, %v796_v30  ;;  %v829_v56 = vmul.f32 %v825_v8, %v821_v48  ;;  %v830_v57 = vmul.f32 %v826_v46, %v820_v47  ;;  %v882_v6 = vpop.permute.xlu2 %881 }
 0x287   : > { %v870_v14 = vmul.f32 %v866_v22, %v796_v30  ;;  %v871_v12 = vmul.f32 %v867_v60, %v797_v11  ;;  %v515_v42 = vperm.slane %v512_v38, 1 }
 0x288   : > { %v811_v53 = vmul.f32 %v809_v39, %v805_v3  ;;  %v812_v15 = vmul.f32 %v809_v39, %v806_v27  ;;  %v835_v62 = vmul.f32 %v833_v28, %v829_v56  ;;  %v836_v1 = vmul.f32 %v833_v28, %v830_v57 }
 0x28a   : > { %v813_v0 = vadd.f32 %v811_v53, %v789_v54  ;;  %v814_v5 = vadd.f32 %v812_v15, %v790_v55 }
 0x28c   : > { %v840_v49 = vpop.permute.xlu0 %839  ;;  %v842_v51 = vpop.permute.xlu1 %841  ;;  %v837_v18 = vadd.f32 %v835_v62, %v813_v0  ;;  %v838_v19 = vadd.f32 %v836_v1, %v814_v5 }
 0x28d   : > { %v844_v61 = vsel %vm843_vm4, %v840_v49, %v842_v51  ;;  %v845_v63 = vsel %vm843_vm4, %v842_v51, %v840_v49 }
 0x28e   : > { %v853_v26 = vmul.f32 %v849_v20, %v844_v61  ;;  %v854_v10 = vmul.f32 %v850_v59, %v845_v63  ;;  %v507_v41 = vpop.permute.xlu2 %506 }
 0x294   : > { %v857_v58 = vpop.permute.xlu0 %856  ;;  %v874_v13 = vpop.permute.xlu1 %873 }
 0x295   : > { %v859_v21 = vmul.f32 %v857_v58, %v853_v26  ;;  %v860_v23 = vmul.f32 %v857_v58, %v854_v10  ;;  %v876_v35 = vmul.f32 %v874_v13, %v870_v14  ;;  %v877_v36 = vmul.f32 %v874_v13, %v871_v12 }
 0x297   : > { %v861_v17 = vadd.f32 %v859_v21, %v837_v18  ;;  %v862_v31 = vadd.f32 %v860_v23, %v838_v19 }
 0x299   : > { %v878_v37 = vadd.f32 %v876_v35, %v861_v17  ;;  %v879_v9 = vadd.f32 %v877_v36, %v862_v31 }
 0x29b   : > { %v884_v32 = vadd.f32 %v882_v6, %v878_v37  ;;  %v885_v7 = vadd.f32 %v882_v6, %v879_v9 }
 0x29c   : > { %v505_v39 = vpop.permute.xlu1 %504  ;;  %v522_v28 = vpop.permute.xlu0 %521 }
 0x29d   : > { %v886_v40 = vsub.f32 0.0, %v884_v32  ;;  %v887_v16 = vsub.f32 0.0, %v885_v7  ;;  %v509_v43 = vsel %vm508_vm5, %v505_v39, %v507_v41  ;;  %v510_v30 = vsel %vm508_vm5, %v507_v41, %v505_v39 }
 0x29e   : > { %v518_v11 = vmul.f32 %v514_v33, %v509_v43  ;;  %v519_v45 = vmul.f32 %v515_v42, %v510_v30 }
 0x29f   : > { %v888_v2 = vmul.f32 1.442695, %v886_v40  ;;  %v890_v44 = vmul.f32 1.442695, %v887_v16 }
 0x2a0   : > { %v524_v3 = vmul.f32 %v522_v28, %v518_v11  ;;  %v525_v27 = vmul.f32 %v522_v28, %v519_v45 }
 0x2a1   : > { %1196 = vpow2.f32 %v888_v2 }
 0x2a2   : > { %1198 = vpow2.f32 %v890_v44  ;;  %v526_v48 = vadd.f32 %v524_v3, %v1772_v4  ;;  %v527_v49 = vadd.f32 %v525_v27, %v1774_v29 }
 0x2a4   : > { %v530_v50 = vpop.permute.xlu1 %529 }
 0x2a5   : > { %v532_v51 = vadd.f32 %v530_v50, %v526_v48  ;;  %v533_v52 = vadd.f32 %v530_v50, %v527_v49 }
 0x2a7   : > { %v1197_v34 = vpop.eup %1196  ;;  %v534_v56 = vmax.f32 %v532_v51, 0.0  ;;  %v535_v57 = vmax.f32 %v533_v52, 0.0 }
 0x2a8   : > { %v1199_v8 = vpop.eup %1198  ;;  %v892_v46 = vadd.f32 1.0, %v1197_v34 }
 0x2a9   : > { %v893_v47 = vadd.f32 1.0, %v1199_v8 }
 0x2aa   : > { %1200 = vrcp.f32 %v892_v46 }
 0x2ab   : > { %1202 = vrcp.f32 %v893_v47 }
 0x2b0   : > { %v1201_v53 = vpop.eup %1200 }
 0x2b1   : > { %v1203_v15 = vpop.eup %1202  ;;  %v896_v54 = vmul.f32 %v1201_v53, %v1647_v24  ;;  %v902_v55 = vrot.slane %v1201_v53, 4 }
 0x2b2   : > { %v897_v4 = vmul.f32 %v1203_v15, %v1649_v25  ;;  %v903_v29 = vrot.slane %v1203_v15, 4 }
 0x2b3   : > { %v906_v20 = vmul.f32 %v902_v55, %v534_v56  ;;  %898 = vst [vmem:[%s261_s10] sm:$0xf] %v896_v54 }
 0x2b4   : > { %v907_v59 = vmul.f32 %v903_v29, %v535_v57  ;;  %899 = vst [vmem:[%s261_s10 + $0x8] sm:$0xf] %v897_v4 }
 0x2b5   : > { %v910_v22 = vrot.slane %v906_v20, 4 }
 0x2b6   : > { %v911_v60 = vrot.slane %v907_v59, 4 }
 0x2b7   : > { %914 = vst [vmem:[%s261_s10] sm:$0xf0] %v910_v22 }
 0x2b8   : > { %915 = vst [vmem:[%s261_s10 + $0x8] sm:$0xf0] %v911_v60 }
 0x2b9   : > { %1351 = shalt.err (!%p1348_p9)
}
 0x2ba   : > { %1068 = dma.vmem_to_hbm [thread:$0]  (%p1538_p13), %s931_s22, 256, %s933_s11, %s917_s12  }
 0x2bb PF: > { %s944_s26 = sand.u32 1, %s1386_s15   ;;  %p1857_p10 = scmp.ge.s32.totalorder %s1398_s18, 2 }
 0x2bc   : > { %s945_s6 = scalar_lea.sflag [#allocation4], %s944_s26 }
 0x2bd   : > { %p1085_p11 = pnand %p1857_p10, %p1543_p4 }
 0x2bf   : > { %p1086_p0 = pneg %p1085_p11 }
 0x2c1   : > { %1381 = dma.done.wait (%p1086_p0), %s945_s6, 256  }
 0x2c2   : > { %1383 = vsyncadd (%p1086_p0), %s945_s6, 4294967040  ;;  %p19_p2 = scmp.ge.s32.totalorder %s1518_s14, 4   ;;  %s1858_s15 = smov %s1390_s16 }
 0x2c3   : > { %s1859_s16 = smov %s1394_s17  ;;  %s1860_s17 = smov %s1530_s21 }
 0x2c4   : > { %s1861_s18 = smov %s1518_s14  ;;  %21 = sbr.rel (!%p19_p2) target bundleno = 7 (0x7), region = 110 }
 0x2c9   :  { %951 = vsyncpa [#allocation3], 1 }
 0x2ca   :  { %953 = vsyncpa [#allocation3 + $0x1], 1 }
 0x2cb   :  { %954 = vsyncpa [#allocation6], 1 }
 0x2cc   :  { %955 = vsyncpa [#allocation9], 1 }
 0x2cd   :  { %956 = vsyncpa [#allocation4], 1 }
 0x2ce   :  { %958 = vsyncpa [#allocation4 + $0x1], 1 }

</bundles_post_ra>
